<compile_context>
chip_gen: v7x
topology: tpu7x:2x2x1
jax: 0.10.0
libtpu: 0.0.40
codegen_flags: <defaults>
</compile_context>

<pallas_src>
import numpy as np
import jax
import jax.numpy as jnp
from jax.experimental import pallas as pl
from jax.experimental.pallas import tpu as pltpu


# ----------------------------------------------------------------------------
# Pallas kernel: fused word/sentence embedding head for one batch tile
# ----------------------------------------------------------------------------
def _bert_head_kernel(l0_ref, l1_ref, l2_ref, l3_ref,  # (Mt, BH) f32 layer tiles (-5..-2)
                      w1_ref,    # (4, BH, D2) bf16  Linear(4*BH -> D2), row-blocked per layer
                      b1_ref,    # (1, D2)     f32
                      w2_ref,    # (D2, E)     bf16  Linear(D2 -> E)
                      b2_ref,    # (1, E)      f32
                      cwb_ref,   # (Bt, Mt)    f32   block-diagonal Conv1d(k=1) weight
                      cb_ref,    # (1, 1)      f32   Conv1d bias
                      words_ref, # (Mt, E)     f32   out: words_emb rows for this tile
                      sent_ref): # (Bt, E)     f32   out: sent_emb rows for this tile
    layer_refs = (l0_ref, l1_ref, l2_ref, l3_ref)

    # cat(layers, dim=-1) @ W1  ==  sum_k  layer_k @ W1[k]   (block matmul, no concat).
    # Layer tiles are cast to bf16 so the MXU runs native bf16; accumulate in f32.
    h1 = jnp.dot(layer_refs[0][...].astype(jnp.bfloat16), w1_ref[0],
                 preferred_element_type=jnp.float32)
    for k in range(1, 4):                                   # static unroll
        h1 = h1 + jnp.dot(layer_refs[k][...].astype(jnp.bfloat16), w1_ref[k],
                          preferred_element_type=jnp.float32)
    h1 = h1 + b1_ref[...]                                   # bias in f32

    # Second Linear -> per-word embeddings (lane-dense, last dim = E).
    y = jnp.dot(h1.astype(jnp.bfloat16), w2_ref[...],
                preferred_element_type=jnp.float32) + b2_ref[...]
    words_ref[...] = y

    # Conv1d(in_channels=seq, out_channels=1, kernel_size=1) over all Bt items
    # of the tile at once via a block-diagonal (Bt, Bt*seq) weight -> (Bt, E).
    # Kept in f32 (tiny matmul, preserves tolerance).
    sent_ref[...] = (jnp.dot(cwb_ref[...], y, preferred_element_type=jnp.float32)
                     + cb_ref[...])


# ----------------------------------------------------------------------------
# Wrapper
# ----------------------------------------------------------------------------
def _pick_batch_tile(batch, seq):
    """Largest divisor Bt of batch with Bt*seq a multiple of 8 and <= 512 rows,
    preferring >= 2 grid steps so v7x's two TensorCores both get work."""
    divs = [d for d in range(1, batch + 1) if batch % d == 0]
    ok = [d for d in divs
          if ((d * seq) % 8 == 0 and (d % 8 == 0 or d == batch)) or d == batch]
    cands = [d for d in ok if d * seq <= 512] or [min(ok)]
    multi = [d for d in cands if batch // d >= 2]
    return max(multi) if multi else max(cands)


def bert_encoder_forward(all_encoder_layers, params, *, batch_tile=None):
    """Mirrors BertEncoder.forward downstream of the (frozen) BERT backbone.

    all_encoder_layers: (n_layers, batch, seq, BH) stacked BERT hidden states (f32)
    returns: words_emb (batch, seq, enc), sent_emb (batch, enc)
    """
    n_layers, batch, seq, BH = all_encoder_layers.shape
    D2, E = params["w2"].shape

    Bt = _pick_batch_tile(batch, seq) if batch_tile is None else batch_tile
    assert batch % Bt == 0
    grid = (batch // Bt,)
    Mt = Bt * seq                                   # matmul M rows per grid step

    # Free (metadata-only) reshape: (n_layers, batch*seq, BH).  The 4 needed
    # layers are selected purely via index_maps below -> no HBM slice copy.
    layers_flat = all_encoder_layers.reshape(n_layers, batch * seq, BH)
    layer_ids = [n_layers - 5 + k for k in range(4)]          # cat order [-5,-4,-3,-2]

    # bf16 weights (tiny one-time cast); biases / conv stay f32.
    w1_bf16 = params["w1"].astype(jnp.bfloat16)               # (4, BH, D2)
    w2_bf16 = params["w2"].astype(jnp.bfloat16)               # (D2, E)
    # Block-diagonal conv weight: row i carries cw over the i-th seq block.
    cw_block = jnp.kron(jnp.eye(Bt, dtype=jnp.float32), params["cw"])  # (Bt, Mt)

    in_specs = (
        [pl.BlockSpec((None, Mt, BH), (lambda b, L=L: (L, b, 0))) for L in layer_ids]
        + [
            pl.BlockSpec((4, BH, D2), lambda b: (0, 0, 0)),   # W1 (resident, constant index)
            pl.BlockSpec((1, D2),     lambda b: (0, 0)),      # b1
            pl.BlockSpec((D2, E),     lambda b: (0, 0)),      # W2 (resident)
            pl.BlockSpec((1, E),      lambda b: (0, 0)),      # b2
            pl.BlockSpec((Bt, Mt),    lambda b: (0, 0)),      # block-diag conv weight
            pl.BlockSpec((1, 1),      lambda b: (0, 0)),      # conv bias
        ])
    out_specs = [
        pl.BlockSpec((Mt, E), lambda b: (b, 0)),              # words_emb rows (lane-dense)
        pl.BlockSpec((Bt, E), lambda b: (b, 0)),              # sent_emb rows (lane-dense)
    ]

    flops = (2 * batch * seq * (4 * BH) * D2          # first Linear (4 block matmuls)
             + 2 * batch * seq * D2 * E               # second Linear
             + 2 * batch * Mt * E)                    # conv reduction
    bytes_accessed = (4 * batch * seq * BH * 4        # layer reads (f32 in HBM)
                      + (4 * BH * D2 + D2 * E) * 2    # bf16 weights
                      + batch * seq * E * 4           # words_emb write
                      + batch * E * 4)                # sent_emb write
    cost = pl.CostEstimate(flops=flops, transcendentals=0,
                           bytes_accessed=bytes_accessed)

    words_flat, sent = pl.pallas_call(
        _bert_head_kernel,
        out_shape=(jax.ShapeDtypeStruct((batch * seq, E), jnp.float32),
                   jax.ShapeDtypeStruct((batch, E), jnp.float32)),
        grid_spec=pltpu.PrefetchScalarGridSpec(
            num_scalar_prefetch=0,
            grid=grid,
            in_specs=in_specs,
            out_specs=out_specs),
        compiler_params=pltpu.CompilerParams(
            dimension_semantics=("parallel",),        # both TCs on v7x; loop on v5e/v6e
            vmem_limit_bytes=48 * 1024 * 1024),       # headroom for real BH=768 weights
        cost_estimate=cost,
    )(layers_flat, layers_flat, layers_flat, layers_flat,   # same HBM buffer, 4 views
      w1_bf16, params["b1"], w2_bf16, params["b2"], cw_block, params["cb"])

    words = words_flat.reshape(batch, seq, E)
    # NOTE: torch .squeeze() on batch==1 would give (enc,); here sent is (batch, enc).
    return words, sent


# ----------------------------------------------------------------------------
# Pure-JAX reference (f32, same math)
# ----------------------------------------------------------------------------
def _reference(all_encoder_layers, params):
    n_layers, batch, seq, BH = all_encoder_layers.shape
    layers4 = all_encoder_layers[-5:-1]
    feats = jnp.concatenate([layers4[k] for k in range(4)], axis=-1)     # (batch, seq, 4*BH)
    w1_full = params["w1"].reshape(4 * BH, -1)                           # (4*BH, D2)
    h1 = feats.reshape(batch * seq, 4 * BH) @ w1_full + params["b1"]
    words = (h1 @ params["w2"] + params["b2"]).reshape(batch, seq, -1)
    sent = jnp.einsum("s,bse->be", params["cw"][0], words) + params["cb"][0, 0]
    return words, sent


# ----------------------------------------------------------------------------
# Deterministic parameter init (shapes from BertEncoder.__init__)
# ----------------------------------------------------------------------------
def init_params(key, bert_hid, emb_size, inp_ch):
    # word_embeddings = Linear(4*BH -> 2*BH), Linear(2*BH -> emb_size)
    # weights stored pre-transposed as (in, out); w1 row-blocked per BERT layer
    # in the cat order [-5,-4,-3,-2] (matches torch reshape of the (4*BH, D2) matrix).
    D1, D2, E = 4 * bert_hid, 2 * bert_hid, emb_size
    ks = jax.random.split(key, 6)
    w1 = jax.random.normal(ks[0], (4, bert_hid, D2), jnp.float32) / np.sqrt(D1)
    b1 = jax.random.uniform(ks[1], (1, D2), jnp.float32, -0.05, 0.05)
    w2 = jax.random.normal(ks[2], (D2, E), jnp.float32) / np.sqrt(D2)
    b2 = jax.random.uniform(ks[3], (1, E), jnp.float32, -0.05, 0.05)
    # sent_embeddings = Conv1d(inp_ch -> 1, kernel_size=1): weight (1, inp_ch, 1), bias (1,)
    cw = jax.random.uniform(ks[4], (1, inp_ch), jnp.float32, -0.1, 0.1)
    cb = jax.random.uniform(ks[5], (1, 1), jnp.float32, -0.1, 0.1)
    return {"w1": w1, "b1": b1, "w2": w2, "b2": b2, "cw": cw, "cb": cb}


if __name__ == "__main__":
    # Small shapes consistent with the module: seq = inp_ch = 30 (fixed by the
    # Conv1d), enc_size = emb_size = 128 (module default), a reduced stand-in
    # BERT hidden of 128 (real BERT uses 768), and batch = 16 so the batch-tile
    # picker uses Bt = 8 (M = 240 rows/step) with a 2-step grid.
    batch, seq = 16, 30
    bert_hid = 128
    emb_size = 128
    n_bert_layers = 6        # >= 5 so that all_encoder_layers[-5:-1] exists

    key = jax.random.PRNGKey(0)
    k_layers, k_par = jax.random.split(key)

    # Stand-in for the frozen BERT backbone's per-layer hidden states.
    all_encoder_layers = jax.random.normal(
        k_layers, (n_bert_layers, batch, seq, bert_hid), jnp.float32)
    params = init_params(k_par, bert_hid, emb_size, seq)

    words, sent = bert_encoder_forward(all_encoder_layers, params)
    jax.block_until_ready((words, sent))

    words_ref, sent_ref = _reference(all_encoder_layers, params)
    assert words.shape == (batch, seq, emb_size)
    assert sent.shape == (batch, emb_size)
    # Tolerance covers bf16 MXU operands (f32 accumulation) vs. the f32 reference.
    np.testing.assert_allclose(np.asarray(words), np.asarray(words_ref), atol=3e-2, rtol=3e-2)
    np.testing.assert_allclose(np.asarray(sent), np.asarray(sent_ref), atol=3e-2, rtol=3e-2)

    print("KERNEL_OK")
</pallas_src>

<mosaic_0001>
module attributes {stable_mosaic.version = 11 : i64} {
  func.func @_bert_head_kernel(%arg0: i32, %arg1: memref<1x240x128xf32, #tpu.memory_space<vmem>>, %arg2: memref<1x240x128xf32, #tpu.memory_space<vmem>>, %arg3: memref<1x240x128xf32, #tpu.memory_space<vmem>>, %arg4: memref<1x240x128xf32, #tpu.memory_space<vmem>>, %arg5: memref<4x128x256xbf16, #tpu.memory_space<vmem>>, %arg6: memref<1x256xf32, #tpu.memory_space<vmem>>, %arg7: memref<256x128xbf16, #tpu.memory_space<vmem>>, %arg8: memref<1x128xf32, #tpu.memory_space<vmem>>, %arg9: memref<8x240xf32, #tpu.memory_space<vmem>>, %arg10: memref<1x1xf32, #tpu.memory_space<vmem>>, %arg11: memref<240x128xf32, #tpu.memory_space<vmem>>, %arg12: memref<8x128xf32, #tpu.memory_space<vmem>>) attributes {dimension_semantics = [#tpu.dimension_semantics<parallel>], iteration_bounds = array<i64: 2>, scalar_prefetch = 0 : i64, scratch_operands = 0 : i64, tpu.core_type = #tpu.core_type<tc>, window_params = [{transform_indices = @transform_0, window_bounds = array<i64: 1, 240, 128>}, {transform_indices = @transform_1, window_bounds = array<i64: 1, 240, 128>}, {transform_indices = @transform_2, window_bounds = array<i64: 1, 240, 128>}, {transform_indices = @transform_3, window_bounds = array<i64: 1, 240, 128>}, {pipeline_mode = #tpu.pipeline_mode<synchronous>, transform_indices = @transform_4, window_bounds = array<i64: 4, 128, 256>}, {pipeline_mode = #tpu.pipeline_mode<synchronous>, transform_indices = @transform_5, window_bounds = array<i64: 1, 256>}, {pipeline_mode = #tpu.pipeline_mode<synchronous>, transform_indices = @transform_6, window_bounds = array<i64: 256, 128>}, {pipeline_mode = #tpu.pipeline_mode<synchronous>, transform_indices = @transform_7, window_bounds = array<i64: 1, 128>}, {pipeline_mode = #tpu.pipeline_mode<synchronous>, transform_indices = @transform_8, window_bounds = array<i64: 8, 240>}, {pipeline_mode = #tpu.pipeline_mode<synchronous>, transform_indices = @transform_9, window_bounds = array<i64: 1, 1>}, {transform_indices = @transform_10, window_bounds = array<i64: 240, 128>}, {transform_indices = @transform_11, window_bounds = array<i64: 8, 128>}]} {
    %c0 = arith.constant 0 : index
    %c0_0 = arith.constant 0 : index
    %c0_1 = arith.constant 0 : index
    %0 = vector.load %arg1[%c0, %c0_0, %c0_1] : memref<1x240x128xf32, #tpu.memory_space<vmem>>, vector<1x240x128xf32>
    %1 = vector.shape_cast %0 : vector<1x240x128xf32> to vector<240x128xf32>
    %2 = arith.truncf %1 : vector<240x128xf32> to vector<240x128xbf16>
    %c0_2 = arith.constant 0 : index
    %c0_3 = arith.constant 0 : index
    %c0_4 = arith.constant 0 : index
    %3 = vector.load %arg5[%c0_2, %c0_3, %c0_4] : memref<4x128x256xbf16, #tpu.memory_space<vmem>>, vector<1x128x256xbf16>
    %4 = vector.shape_cast %3 : vector<1x128x256xbf16> to vector<128x256xbf16>
    %cst = arith.constant dense<0.000000e+00> : vector<240x256xf32>
    %5 = tpu.matmul %2, %4, %cst {dimension_numbers = #tpu.dot_dimension_numbers<[1], [0], [0], [1], [0, 0, 1, 1], [], []>} : vector<240x128xbf16>, vector<128x256xbf16>, vector<240x256xf32> -> vector<240x256xf32>
    %c0_5 = arith.constant 0 : index
    %c0_6 = arith.constant 0 : index
    %c0_7 = arith.constant 0 : index
    %6 = vector.load %arg2[%c0_5, %c0_6, %c0_7] : memref<1x240x128xf32, #tpu.memory_space<vmem>>, vector<1x240x128xf32>
    %7 = vector.shape_cast %6 : vector<1x240x128xf32> to vector<240x128xf32>
    %8 = arith.truncf %7 : vector<240x128xf32> to vector<240x128xbf16>
    %c1 = arith.constant 1 : index
    %c0_8 = arith.constant 0 : index
    %c0_9 = arith.constant 0 : index
    %9 = vector.load %arg5[%c1, %c0_8, %c0_9] : memref<4x128x256xbf16, #tpu.memory_space<vmem>>, vector<1x128x256xbf16>
    %10 = vector.shape_cast %9 : vector<1x128x256xbf16> to vector<128x256xbf16>
    %cst_10 = arith.constant dense<0.000000e+00> : vector<240x256xf32>
    %11 = tpu.matmul %8, %10, %cst_10 {dimension_numbers = #tpu.dot_dimension_numbers<[1], [0], [0], [1], [0, 0, 1, 1], [], []>} : vector<240x128xbf16>, vector<128x256xbf16>, vector<240x256xf32> -> vector<240x256xf32>
    %12 = arith.addf %5, %11 : vector<240x256xf32>
    %c0_11 = arith.constant 0 : index
    %c0_12 = arith.constant 0 : index
    %c0_13 = arith.constant 0 : index
    %13 = vector.load %arg3[%c0_11, %c0_12, %c0_13] : memref<1x240x128xf32, #tpu.memory_space<vmem>>, vector<1x240x128xf32>
    %14 = vector.shape_cast %13 : vector<1x240x128xf32> to vector<240x128xf32>
    %15 = arith.truncf %14 : vector<240x128xf32> to vector<240x128xbf16>
    %c2 = arith.constant 2 : index
    %c0_14 = arith.constant 0 : index
    %c0_15 = arith.constant 0 : index
    %16 = vector.load %arg5[%c2, %c0_14, %c0_15] : memref<4x128x256xbf16, #tpu.memory_space<vmem>>, vector<1x128x256xbf16>
    %17 = vector.shape_cast %16 : vector<1x128x256xbf16> to vector<128x256xbf16>
    %cst_16 = arith.constant dense<0.000000e+00> : vector<240x256xf32>
    %18 = tpu.matmul %15, %17, %cst_16 {dimension_numbers = #tpu.dot_dimension_numbers<[1], [0], [0], [1], [0, 0, 1, 1], [], []>} : vector<240x128xbf16>, vector<128x256xbf16>, vector<240x256xf32> -> vector<240x256xf32>
    %19 = arith.addf %12, %18 : vector<240x256xf32>
    %c0_17 = arith.constant 0 : index
    %c0_18 = arith.constant 0 : index
    %c0_19 = arith.constant 0 : index
    %20 = vector.load %arg4[%c0_17, %c0_18, %c0_19] : memref<1x240x128xf32, #tpu.memory_space<vmem>>, vector<1x240x128xf32>
    %21 = vector.shape_cast %20 : vector<1x240x128xf32> to vector<240x128xf32>
    %22 = arith.truncf %21 : vector<240x128xf32> to vector<240x128xbf16>
    %c3 = arith.constant 3 : index
    %c0_20 = arith.constant 0 : index
    %c0_21 = arith.constant 0 : index
    %23 = vector.load %arg5[%c3, %c0_20, %c0_21] : memref<4x128x256xbf16, #tpu.memory_space<vmem>>, vector<1x128x256xbf16>
    %24 = vector.shape_cast %23 : vector<1x128x256xbf16> to vector<128x256xbf16>
    %cst_22 = arith.constant dense<0.000000e+00> : vector<240x256xf32>
    %25 = tpu.matmul %22, %24, %cst_22 {dimension_numbers = #tpu.dot_dimension_numbers<[1], [0], [0], [1], [0, 0, 1, 1], [], []>} : vector<240x128xbf16>, vector<128x256xbf16>, vector<240x256xf32> -> vector<240x256xf32>
    %26 = arith.addf %19, %25 : vector<240x256xf32>
    %c0_23 = arith.constant 0 : index
    %c0_24 = arith.constant 0 : index
    %27 = vector.load %arg6[%c0_23, %c0_24] : memref<1x256xf32, #tpu.memory_space<vmem>>, vector<1x256xf32>
    %28 = vector.broadcast %27 : vector<1x256xf32> to vector<240x256xf32>
    %29 = arith.addf %26, %28 : vector<240x256xf32>
    %30 = arith.truncf %29 : vector<240x256xf32> to vector<240x256xbf16>
    %c0_25 = arith.constant 0 : index
    %c0_26 = arith.constant 0 : index
    %31 = vector.load %arg7[%c0_25, %c0_26] : memref<256x128xbf16, #tpu.memory_space<vmem>>, vector<256x128xbf16>
    %cst_27 = arith.constant dense<0.000000e+00> : vector<240x128xf32>
    %32 = tpu.matmul %30, %31, %cst_27 {dimension_numbers = #tpu.dot_dimension_numbers<[1], [0], [0], [1], [0, 0, 1, 1], [], []>} : vector<240x256xbf16>, vector<256x128xbf16>, vector<240x128xf32> -> vector<240x128xf32>
    %c0_28 = arith.constant 0 : index
    %c0_29 = arith.constant 0 : index
    %33 = vector.load %arg8[%c0_28, %c0_29] : memref<1x128xf32, #tpu.memory_space<vmem>>, vector<1x128xf32>
    %34 = vector.broadcast %33 : vector<1x128xf32> to vector<240x128xf32>
    %35 = arith.addf %32, %34 : vector<240x128xf32>
    %c0_30 = arith.constant 0 : index
    %c0_31 = arith.constant 0 : index
    %36 = vector.load %arg11[%c0_30, %c0_31] : memref<240x128xf32, #tpu.memory_space<vmem>>, vector<240x128xf32>
    tpu.vector_store %arg11[%c0_30, %c0_31], %35 {strides = array<i32>} : memref<240x128xf32, #tpu.memory_space<vmem>>, vector<240x128xf32>,
    %c0_32 = arith.constant 0 : index
    %c0_33 = arith.constant 0 : index
    %37 = vector.load %arg9[%c0_32, %c0_33] : memref<8x240xf32, #tpu.memory_space<vmem>>, vector<8x240xf32>
    %cst_34 = arith.constant dense<0.000000e+00> : vector<8x128xf32>
    %38 = tpu.matmul %37, %35, %cst_34 {dimension_numbers = #tpu.dot_dimension_numbers<[1], [0], [0], [1], [0, 0, 1, 1], [], []>} : vector<8x240xf32>, vector<240x128xf32>, vector<8x128xf32> -> vector<8x128xf32>
    %c0_35 = arith.constant 0 : index
    %c0_36 = arith.constant 0 : index
    %39 = vector.load %arg10[%c0_35, %c0_36] : memref<1x1xf32, #tpu.memory_space<vmem>>, vector<1x1xf32>
    %40 = vector.broadcast %39 : vector<1x1xf32> to vector<8x128xf32>
    %41 = arith.addf %38, %40 : vector<8x128xf32>
    %c0_37 = arith.constant 0 : index
    %c0_38 = arith.constant 0 : index
    %42 = vector.load %arg12[%c0_37, %c0_38] : memref<8x128xf32, #tpu.memory_space<vmem>>, vector<8x128xf32>
    tpu.vector_store %arg12[%c0_37, %c0_38], %41 {strides = array<i32>} : memref<8x128xf32, #tpu.memory_space<vmem>>, vector<8x128xf32>,
    return
  }
  func.func @transform_0(%arg0: i32) -> (i32, i32, i32) {
    %c1_i32 = arith.constant 1 : i32
    %c0_i32 = arith.constant 0 : i32
    %c0_i32_0 = arith.constant 0 : i32
    return %c1_i32, %arg0, %c0_i32 : i32, i32, i32
  }
  func.func @transform_1(%arg0: i32) -> (i32, i32, i32) {
    %c2_i32 = arith.constant 2 : i32
    %c0_i32 = arith.constant 0 : i32
    %c0_i32_0 = arith.constant 0 : i32
    return %c2_i32, %arg0, %c0_i32 : i32, i32, i32
  }
  func.func @transform_2(%arg0: i32) -> (i32, i32, i32) {
    %c3_i32 = arith.constant 3 : i32
    %c0_i32 = arith.constant 0 : i32
    %c0_i32_0 = arith.constant 0 : i32
    return %c3_i32, %arg0, %c0_i32 : i32, i32, i32
  }
  func.func @transform_3(%arg0: i32) -> (i32, i32, i32) {
    %c4_i32 = arith.constant 4 : i32
    %c0_i32 = arith.constant 0 : i32
    %c0_i32_0 = arith.constant 0 : i32
    return %c4_i32, %arg0, %c0_i32 : i32, i32, i32
  }
  func.func @transform_4(%arg0: i32) -> (i32, i32, i32) {
    %c0_i32 = arith.constant 0 : i32
    %c0_i32_0 = arith.constant 0 : i32
    %c0_i32_1 = arith.constant 0 : i32
    %c0_i32_2 = arith.constant 0 : i32
    return %c0_i32, %c0_i32_0, %c0_i32_1 : i32, i32, i32
  }
  func.func @transform_5(%arg0: i32) -> (i32, i32) {
    %c0_i32 = arith.constant 0 : i32
    %c0_i32_0 = arith.constant 0 : i32
    %c0_i32_1 = arith.constant 0 : i32
    return %c0_i32, %c0_i32_0 : i32, i32
  }
  func.func @transform_6(%arg0: i32) -> (i32, i32) {
    %c0_i32 = arith.constant 0 : i32
    %c0_i32_0 = arith.constant 0 : i32
    %c0_i32_1 = arith.constant 0 : i32
    return %c0_i32, %c0_i32_0 : i32, i32
  }
  func.func @transform_7(%arg0: i32) -> (i32, i32) {
    %c0_i32 = arith.constant 0 : i32
    %c0_i32_0 = arith.constant 0 : i32
    %c0_i32_1 = arith.constant 0 : i32
    return %c0_i32, %c0_i32_0 : i32, i32
  }
  func.func @transform_8(%arg0: i32) -> (i32, i32) {
    %c0_i32 = arith.constant 0 : i32
    %c0_i32_0 = arith.constant 0 : i32
    %c0_i32_1 = arith.constant 0 : i32
    return %c0_i32, %c0_i32_0 : i32, i32
  }
  func.func @transform_9(%arg0: i32) -> (i32, i32) {
    %c0_i32 = arith.constant 0 : i32
    %c0_i32_0 = arith.constant 0 : i32
    %c0_i32_1 = arith.constant 0 : i32
    return %c0_i32, %c0_i32_0 : i32, i32
  }
  func.func @transform_10(%arg0: i32) -> (i32, i32) {
    %c0_i32 = arith.constant 0 : i32
    %c0_i32_0 = arith.constant 0 : i32
    return %arg0, %c0_i32 : i32, i32
  }
  func.func @transform_11(%arg0: i32) -> (i32, i32) {
    %c0_i32 = arith.constant 0 : i32
    %c0_i32_0 = arith.constant 0 : i32
    return %arg0, %c0_i32 : i32, i32
  }
}

</mosaic_0001>

<bundles_post_ra>
// kernel: tpu_custom_call.1
= control target key start
LH: loop header
LB: loop body
LE: loop exit
PB: predicated region body
PF: predicated region fallthrough
CT: control target
= control target key end

     0   :  { %s5007_s0 = inlined_call_operand.hbm [shape: f32[6,480,128], index: 0, kind: input, shape index: {}]   ;;  %s5008_s1 = inlined_call_operand.hbm [shape: f32[6,480,128], index: 1, kind: input, shape index: {}]   ;;  %s5009_s2 = inlined_call_operand.hbm [shape: f32[6,480,128], index: 2, kind: input, shape index: {}]   ;;  %s5010_s3 = inlined_call_operand.hbm [shape: f32[6,480,128], index: 3, kind: input, shape index: {}]   ;;  %s5011_s4 = inlined_call_operand.hbm [shape: bf16[4,128,256], index: 4, kind: input, shape index: {}]   ;;  %s5012_s5 = inlined_call_operand.hbm [shape: f32[1,256], index: 5, kind: input, shape index: {}]   ;;  %s5013_s6 = inlined_call_operand.hbm [shape: bf16[256,128], index: 6, kind: input, shape index: {}]   ;;  %s5014_s7 = inlined_call_operand.hbm [shape: f32[1,128], index: 7, kind: input, shape index: {}]   ;;  %s5015_s8 = inlined_call_operand.hbm [shape: f32[8,240], index: 8, kind: input, shape index: {}]   ;;  %s5016_s9 = inlined_call_operand.<no memory space> [shape: f32[1,1], index: 9, kind: input, shape index: {}]   ;;  %s5017_s10 = inlined_call_operand.hbm [shape: f32[480,128], index: 10, kind: output, shape index: {0}]   ;;  %s5018_s11 = inlined_call_operand.hbm [shape: f32[16,128], index: 11, kind: output, shape index: {1}]  }
   0x1   :  { %5051 = sst [smem:[#allocation47_spill]] %s5008_s1  ;;  %v17_v0 = vstv %s5016_s9 }
   0x2   :  { %5052 = sst [smem:[#allocation48_spill]] %s5011_s4  ;;  %18 = vst [vmem:[#allocation2] sm:$0x1] %v17_v0 }
   0x3   :  { %5053 = sst [smem:[#allocation49_spill]] %s5012_s5 }
   0x4   :  { %5054 = sst [smem:[#allocation50_spill]] %s5014_s7 }
   0x5   :  { %5055 = sst [smem:[#allocation51_spill]] %s5017_s10 }
   0x6   :  { %5056 = sst [smem:[#allocation52_spill]] %s5018_s11 }
   0x7   :  { %19 = vsyncpa [#allocation4], 0 }
   0x8   :  { %21 = vsyncpa [#allocation4 + $0x1], 0 }
   0x9   :  { %22 = vsyncpa [#allocation7], 0 }
   0xa   :  { %24 = vsyncpa [#allocation7 + $0x1], 0 }
   0xb   :  { %25 = vsyncpa [#allocation10], 0 }
   0xc   :  { %27 = vsyncpa [#allocation10 + $0x1], 0 }
   0xd   :  { %28 = vsyncpa [#allocation13], 0 }
   0xe   :  { %29 = vsyncpa [#allocation16], 0 }
   0xf   :  { %30 = vsyncpa [#allocation5], 0 }
  0x10   :  { %32 = vsyncpa [#allocation5 + $0x1], 0 }
  0x11   :  { %33 = vsyncpa [#allocation20], 0 }
  0x12   :  { %35 = vsyncpa [#allocation20 + $0x1], 0  ;;  %s3959_s19 = smov 0   ;;  %s3961_s20 = smov 0  }
  0x13   :  { %s3963_s21 = smov 0   ;;  %s3965_s9 = smov 0  }
  0x14 LB: > { %5057 = sst [smem:[#allocation29_spill]] %s3863_s19  ;;  %s3980_s22 = sadd.s32 4294967295, %s3875_s9   ;;  %s3875_s9 = sphi %s3965_s9, %s5125_s9   ;;  %s3871_s21 = sphi %s3963_s21, %s5129_s21   ;;  %s3867_s20 = sphi %s3961_s20, %s5128_s20   ;;  %s3863_s19 = sphi %s3959_s19, %s5126_s19  }
  0x15   : > { %5058 = sst [smem:[#allocation30_spill]] %s3867_s20  ;;  %s2795_s23 = sadd.s32 4294967294, %s3875_s9  }
  0x16   : > { %5059 = sst [smem:[#allocation31_spill]] %s3980_s22  ;;  %p61_p0 = scmp.ne.s32.totalorder %s3867_s20, %s3863_s19 }
  0x17   : > { %p5019_p1 = scmp.eq.s32.totalorder %s3980_s22, 0  ;;  %p295_p3 = scmp.eq.s32.totalorder %s2795_s23, 1 }
  0x18   : > { %p2796_p5 = scmp.ge.s32.totalorder %s3875_s9, 1  ;;  %p328_p7 = scmp.lt.s32.totalorder %s3875_s9, 3 }
  0x19   : > { %p3989_p4 = por %p5019_p1, %p61_p0  ;;  %p3994_p6 = por %p295_p3, %p61_p0 }
  0x1a   : > { %p3999_p8 = pnand %p2796_p5, %p328_p7  ;;  %s3877_s27 = smov [#allocation11]  }
  0x1b   : > { %s5060_s24 = scalar_select %p3989_p4, 1, 0 }
  0x1c   : > { %s5062_s25 = scalar_select %p3994_p6, 1, 0 }
  0x1d   : > { %5061 = sst [smem:[#allocation32_spill]] %s5060_s24  ;;  %s340_s28 = sshll.u32 %s3877_s27, 4  ;;  %s4003_s28 = int_to_ptr.vmem [resolvable:$true] %s340_s28 }
  0x1e   : > { %5063 = sst [smem:[#allocation33_spill]] %s5062_s25  ;;  %p3287_p9 = pneg %p3999_p8 }
  0x1f   : > { %s5064_s26 = scalar_select %p3999_p8, 1, 0 }
  0x20   : > { %p4010_p11 = pnand %p3287_p9, %p5019_p1  ;;  %s3878_s30 = smov [#allocation12]  }
  0x21   : > { %5065 = sst [smem:[#allocation34_spill]] %s5064_s26  ;;  %s354_s12 = sshll.u32 %s3878_s30, 4  ;;  %s4014_s12 = int_to_ptr.vmem [resolvable:$true] %s354_s12 }
  0x22   : > { %s5066_s29 = scalar_select %p4010_p11, 1, 0 }
  0x23   : > { %s3879_s13 = smov [#allocation15]   ;;  %s5067_s4 = sld [smem:[#allocation48_spill]] }
  0x24   : > { %s4016_s14 = sshll.u32 %s3879_s13, 4  ;;  %p4026_p13 = pneg %p4010_p11  ;;  %s379_s14 = int_to_ptr.vmem [resolvable:$true] %s4016_s14 }
  0x26   : > { %s5068_s27 = scalar_select %p4026_p13, 1, 0 }
  0x29   : > { %s3493_s17 = scalar_lea.hbm %s5067_s4, 8192 }
  0x2a   : > { %p3494_p12 = scmp.ne.s32.totalorder %s5067_s4, %s3493_s17  ;;  %p3500_p5 = scmp.lt.u32.totalorder %s3493_s17, %s5067_s4 }
  0x2c   : > { %p3496_p0 = pnand %p4026_p13, %p3494_p12 }
  0x2e   : > { %p3497_p3 = pneg %p3496_p0 }
  0x30   : > { %p3502_p7 = pnand %p3500_p5, %p3497_p3 }
  0x32   : > { %3505 = shalt.err (!%p3502_p7)
}
  0x33   : > { %s3506_s15 = scalar_lea.vmem %s4003_s28, 8192  ;;  %p3514_p2 = scmp.lt.s32.totalorder %s4003_s28, %s4003_s28 }
  0x34   : > { %p3507_p9 = scmp.ne.s32.totalorder %s4003_s28, %s3506_s15  ;;  %p3515_p6 = scmp.lt.s32.totalorder %s3506_s15, %s3506_s15 }
  0x36   : > { %p3509_p10 = pnand %p3507_p9, %p4026_p13  ;;  %p3516_p12 = por %p3515_p6, %p3514_p2 }
  0x38   : > { %p3510_p1 = pneg %p3509_p10 }
  0x3a   : > { %p3517_p0 = pnand %p3516_p12, %p3510_p1 }
  0x3c   : > { %3520 = shalt.err (!%p3517_p0)
}
  0x3d   : > { %s5026_s16 = smov 128   ;;  %s5028_s17 = smov 8  }
  0x3e   : > { %3290 = dma.hbm_to_vmem [thread:$0]  (!%p4010_p11), %s5067_s4, 8192, %s4003_s28, [#allocation10], %s5026_s16, %s5026_s16, %s5028_s17  }
  0x3f   : > { %s5069_s5 = sld [smem:[#allocation49_spill]] }
  0x45   : > { %s3521_s15 = scalar_lea.hbm %s5069_s5, 32 }
  0x46   : > { %p3522_p1 = scmp.ne.s32.totalorder %s5069_s5, %s3521_s15  ;;  %p3528_p10 = scmp.lt.u32.totalorder %s3521_s15, %s5069_s5 }
  0x48   : > { %p3524_p2 = pnand %p3522_p1, %p4026_p13 }
  0x4a   : > { %p3525_p6 = pneg %p3524_p2 }
  0x4c   : > { %p3530_p3 = pnand %p3528_p10, %p3525_p6 }
  0x4e   : > { %3533 = shalt.err (!%p3530_p3)
}
  0x4f   : > { %s3534_s28 = scalar_lea.vmem %s4014_s12, 32  ;;  %p3542_p12 = scmp.lt.s32.totalorder %s4014_s12, %s4014_s12 }
  0x50   : > { %p3535_p5 = scmp.ne.s32.totalorder %s4014_s12, %s3534_s28  ;;  %p3543_p0 = scmp.lt.s32.totalorder %s3534_s28, %s3534_s28 }
  0x52   : > { %p3537_p7 = pnand %p3535_p5, %p4026_p13  ;;  %p3544_p1 = por %p3543_p0, %p3542_p12 }
  0x54   : > { %p3538_p9 = pneg %p3537_p7 }
  0x56   : > { %p3545_p2 = pnand %p3544_p1, %p3538_p9 }
  0x58   : > { %3548 = shalt.err (!%p3545_p2)
}
  0x59   : > { %3293 = dma.hbm_to_vmem [thread:$0]  (!%p4010_p11), %s5069_s5, 32, %s4014_s12, [#allocation13]  }
  0x5a   : > { %s5070_s7 = sld [smem:[#allocation50_spill]] }
  0x60   : > { %s3549_s18 = scalar_lea.hbm %s5070_s7, 16 }
  0x61   : > { %p3550_p6 = scmp.ne.s32.totalorder %s5070_s7, %s3549_s18  ;;  %p3556_p5 = scmp.lt.u32.totalorder %s3549_s18, %s5070_s7 }
  0x63   : > { %p3552_p10 = pnand %p3550_p6, %p4026_p13 }
  0x65   : > { %p3553_p3 = pneg %p3552_p10 }
  0x67   : > { %p3558_p7 = pnand %p3556_p5, %p3553_p3 }
  0x69   : > { %3561 = shalt.err (!%p3558_p7)
}
  0x6a   : > { %s3562_s28 = scalar_lea.vmem %s379_s14, 16  ;;  %s3569_s12 = scalar_lea.vmem %s379_s14, 32 }
  0x6b   : > { %p3563_p9 = scmp.ne.s32.totalorder %s379_s14, %s3562_s28  ;;  %p3570_p1 = scmp.lt.s32.totalorder %s379_s14, %s379_s14 }
  0x6c   : > { %p3571_p2 = scmp.lt.s32.totalorder %s3569_s12, %s3562_s28 }
  0x6d   : > { %p3565_p12 = pnand %p3563_p9, %p4026_p13 }
  0x6e   : > { %p3572_p4 = por %p3571_p2, %p3570_p1 }
  0x6f   : > { %p3566_p0 = pneg %p3565_p12 }
  0x71   : > { %p3573_p8 = pnand %p3572_p4, %p3566_p0 }
  0x73   : > { %3576 = shalt.err (!%p3573_p8)
}
  0x74   : > { %3299 = dma.hbm_to_vmem [thread:$0]  (!%p4010_p11), %s5070_s7, 16, %s379_s14, [#allocation16]  }
  0x75   : > { %s4093_s19 = sadd.s32 1, %s3875_s9   ;;  %s48_s18 = sadd.s32 1, %s3871_s21 }
  0x76   : > { %5071 = sst [smem:[#allocation35_spill]] %s4093_s19  ;;  %s45_s25 = ssub.s32 %s3875_s9, %s4093_s19 }
  0x77   : > { %p46_p4 = scmp.eq.s32.totalorder %s45_s25, 0  ;;  %p55_p8 = scmp.ne.s32.totalorder %s3871_s21, %s3867_s20 }
  0x78   : > { %p56_p6 = scmp.eq.s32.totalorder %s3875_s9, 0  ;;  %p3328_p10 = scmp.lt.s32.totalorder %s3875_s9, 2 }
  0x79   : > { %s4103_s23 = scalar_select %p46_p4, %s3871_s21, %s48_s18  }
  0x7a   : > { %p57_p3 = por %p56_p6, %p55_p8  ;;  %p5073_p5 = scmp.eq.s32.totalorder %s3980_s22, 1 }
  0x7b   : > { %5072 = sst [smem:[#allocation36_spill]] %s4103_s23  ;;  %s5030_s13 = sand.u32 1, %s3871_s21  }
  0x7c   : > { %p4107_p7 = por %p5073_p5, %p55_p8  ;;  %s4113_s14 = smul.u32 3840, %s3875_s9 }
  0x7d   : > { %s4117_s15 = smul.u32 240, %s5030_s13  ;;  %p4119_p9 = pnand %p3328_p10, %p57_p3 }
  0x7e   : > { %s5074_s30 = scalar_select %p4107_p7, 1, 0 }
  0x7f   : > { %s5076_s28 = scalar_select %p4119_p9, 1, 0 }
  0x80   : > { %5075 = sst [smem:[#allocation37_spill]] %s5074_s30  ;;  %s5036_s12 = sand.u32 1, %s3875_s9  }
  0x81   : > { %s5077_s1 = sld [smem:[#allocation47_spill]]  ;;  %s429_s16 = scalar_lea.vmem [#allocation6], %s4117_s15 }
  0x82   : > { %s437_s17 = sshll.u32 %s429_s16, 4  ;;  %s4135_s13 = scalar_lea.sflag [#allocation7], %s5036_s12  ;;  %s4131_s17 = int_to_ptr.vmem [resolvable:$true] %s437_s17 }
  0x83   : > { %p4140_p0 = pneg %p4119_p9 }
  0x85   : > { %s5078_s5 = scalar_select %p4140_p0, 1, 0 }
  0x87   : > { %s2628_s25 = scalar_lea.hbm %s5077_s1, %s4113_s14  ;;  %s3582_s16 = scalar_lea.hbm %s5077_s1, 46080 }
  0x88   : > { %s4128_s18 = scalar_lea.hbm %s2628_s25, 15360  ;;  %s3607_s4 = scalar_lea.hbm %s2628_s25, 19200 }
  0x89   : > { %p3578_p12 = scmp.ne.s32.totalorder %s4128_s18, %s3607_s4  ;;  %p3583_p4 = scmp.lt.u32.totalorder %s4128_s18, %s5077_s1 }
  0x8a   : > { %p3584_p8 = scmp.lt.u32.totalorder %s3582_s16, %s3607_s4  ;;  %p3586_p10 = scmp.lt.u32.totalorder %s3607_s4, %s4128_s18 }
  0x8b   : > { %p3580_p1 = pnand %p4140_p0, %p3578_p12 }
  0x8c   : > { %p3585_p6 = por %p3584_p8, %p3583_p4 }
  0x8d   : > { %p3581_p2 = pneg %p3580_p1 }
  0x8e   : > { %p3587_p3 = por %p3586_p10, %p3585_p6 }
  0x90   : > { %p3588_p5 = pnand %p3587_p3, %p3581_p2 }
  0x92   : > { %3591 = shalt.err (!%p3588_p5)
}
  0x93   : > { %s3592_s25 = scalar_lea.vmem %s4131_s17, 3840  ;;  %s3882_s10 = smov [#allocation6]  }
  0x94   : > { %p3593_p12 = scmp.ne.s32.totalorder %s4131_s17, %s3592_s25  ;;  %s3597_s11 = sshll.u32 %s3882_s10, 4  ;;  %s3598_s11 = int_to_ptr.vmem [resolvable:$false] %s3597_s11 }
  0x95   : > { %s3599_s7 = scalar_lea.vmem %s3598_s11, 7680  ;;  %p3600_p11 = scmp.lt.s32.totalorder %s4131_s17, %s3598_s11 }
  0x96   : > { %p3595_p1 = pnand %p3593_p12, %p4140_p0  ;;  %p3601_p13 = scmp.lt.s32.totalorder %s3599_s7, %s3592_s25 }
  0x98   : > { %p3596_p7 = pneg %p3595_p1  ;;  %p3602_p4 = por %p3601_p13, %p3600_p11 }
  0x9a   : > { %p3603_p8 = pnand %p3602_p4, %p3596_p7 }
  0x9c   : > { %3606 = shalt.err (!%p3603_p8)
}
  0x9d   : > { %s5079_s4 = smov 8   ;;  %s5080_s23 = smov 128  }
  0x9e   : > { %3309 = dma.hbm_to_vmem [thread:$0]  (!%p4119_p9), %s4128_s18, 3840, %s4131_s17, %s4135_s13, %s5080_s23, %s5080_s23, %s5079_s4  }
  0x9f   : > { %s3883_s16 = smov [#allocation14]   ;;  %s3608_s25 = scalar_lea.hbm %s5013_s6, 2048 }
  0xa0   : > { %s364_s12 = sshll.u32 %s3883_s16, 4  ;;  %p3609_p11 = scmp.ne.s32.totalorder %s5013_s6, %s3608_s25  ;;  %s365_s12 = int_to_ptr.vmem [resolvable:$true] %s364_s12 }
  0xa1   : > { %p5081_p13 = scmp.ne.s32.totalorder %s5068_s27, 0  ;;  %p3615_p6 = scmp.lt.u32.totalorder %s3608_s25, %s5013_s6 }
  0xa3   : > { %p3611_p7 = pnand %p3609_p11, %p5081_p13 }
  0xa5   : > { %p3612_p2 = pneg %p3611_p7 }
  0xa7   : > { %p3617_p10 = pnand %p3615_p6, %p3612_p2 }
  0xa9   : > { %3620 = shalt.err (!%p3617_p10)
}
  0xaa   : > { %s3621_s17 = scalar_lea.vmem %s365_s12, 2048  ;;  %p3629_p1 = scmp.lt.s32.totalorder %s365_s12, %s365_s12 }
  0xab   : > { %p3622_p3 = scmp.ne.s32.totalorder %s365_s12, %s3621_s17  ;;  %p3630_p4 = scmp.lt.s32.totalorder %s3621_s17, %s3621_s17 }
  0xad   : > { %p3624_p5 = pnand %p3622_p3, %p5081_p13  ;;  %p3631_p8 = por %p3630_p4, %p3629_p1 }
  0xaf   : > { %p3625_p12 = pneg %p3624_p5 }
  0xb1   : > { %p3632_p9 = pnand %p3631_p8, %p3625_p12 }
  0xb3   : > { %3635 = shalt.err (!%p3632_p9)
}
  0xb4   : > { %s3884_s1 = smov 64   ;;  %s3885_s18 = smov 4  }
  0xb5   : > { %p5082_p11 = scmp.ne.s32.totalorder %s5066_s29, 0  ;;  %s3886_s16 = smov [#allocation17]  }
  0xb6   : > { %s389_s10 = sshll.u32 %s3886_s16, 4  ;;  %s2621_s7 = scalar_lea.hbm %s5007_s0, %s4113_s14  ;;  %s390_s10 = int_to_ptr.vmem [resolvable:$true] %s389_s10 }
  0xb7   : > { %3296 = dma.hbm_to_vmem [thread:$0]  (!%p5082_p11), %s5013_s6, 2048, %s365_s12, [#allocation13], %s3884_s1, %s3884_s1, %s3885_s18  }
  0xb8   : > { %s3636_s24 = scalar_lea.hbm %s5015_s8, 256 }
  0xb9   : > { %p3637_p9 = scmp.ne.s32.totalorder %s5015_s8, %s3636_s24  ;;  %p3643_p6 = scmp.lt.u32.totalorder %s3636_s24, %s5015_s8 }
  0xbb   : > { %p3639_p7 = pnand %p3637_p9, %p5081_p13 }
  0xbd   : > { %p3640_p2 = pneg %p3639_p7 }
  0xbf   : > { %p3645_p10 = pnand %p3643_p6, %p3640_p2 }
  0xc1   : > { %3648 = shalt.err (!%p3645_p10)
}
  0xc2   : > { %s3649_s1 = scalar_lea.vmem %s390_s10, 256  ;;  %p3657_p1 = scmp.lt.s32.totalorder %s390_s10, %s390_s10 }
  0xc3   : > { %p3650_p3 = scmp.ne.s32.totalorder %s390_s10, %s3649_s1  ;;  %p3658_p4 = scmp.lt.s32.totalorder %s3649_s1, %s3649_s1 }
  0xc5   : > { %p3652_p5 = pnand %p3650_p3, %p5081_p13  ;;  %p3659_p8 = por %p3658_p4, %p3657_p1 }
  0xc7   : > { %p3653_p12 = pneg %p3652_p5 }
  0xc9   : > { %p3660_p0 = pnand %p3659_p8, %p3653_p12 }
  0xcb   : > { %3663 = shalt.err (!%p3660_p0)
}
  0xcc   : > { %3302 = dma.hbm_to_vmem [thread:$0]  (!%p5082_p11), %s5015_s8, 256, %s390_s10, [#allocation16]  }
  0xcd   : > { %s4207_s24 = scalar_lea.hbm %s2621_s7, 7680  ;;  %s407_s26 = scalar_lea.vmem [#allocation3], %s4117_s15 }
  0xce   : > { %s415_s27 = sshll.u32 %s407_s26, 4  ;;  %s5083_s18 = sand.u32 1, %s3871_s21   ;;  %s4210_s27 = int_to_ptr.vmem [resolvable:$true] %s415_s27 }
  0xcf   : > { %s4214_s30 = scalar_lea.sflag [#allocation4], %s5083_s18  ;;  %s3694_s29 = scalar_lea.hbm %s2621_s7, 11520 }
  0xd0   : > { %p3665_p0 = scmp.ne.s32.totalorder %s4207_s24, %s3694_s29  ;;  %p5084_p13 = scmp.ne.s32.totalorder %s5078_s5, 0 }
  0xd1   : > { %s3669_s10 = scalar_lea.hbm %s5007_s0, 46080  ;;  %p3670_p11 = scmp.lt.u32.totalorder %s4207_s24, %s5007_s0 }
  0xd2   : > { %p3667_p9 = pnand %p3665_p0, %p5084_p13  ;;  %p3671_p2 = scmp.lt.u32.totalorder %s3669_s10, %s3694_s29 }
  0xd3   : > { %p3673_p10 = scmp.lt.u32.totalorder %s3694_s29, %s4207_s24 }
  0xd4   : > { %p3668_p7 = pneg %p3667_p9  ;;  %p3672_p6 = por %p3671_p2, %p3670_p11 }
  0xd6   : > { %p3674_p3 = por %p3673_p10, %p3672_p6 }
  0xd8   : > { %p3675_p5 = pnand %p3674_p3, %p3668_p7 }
  0xda   : > { %3678 = shalt.err (!%p3675_p5)
}
  0xdb   : > { %s3679_s7 = scalar_lea.vmem %s4210_s27, 3840  ;;  %s3887_s19 = smov [#allocation3]  }
  0xdc   : > { %p3680_p12 = scmp.ne.s32.totalorder %s4210_s27, %s3679_s7  ;;  %s3684_s12 = sshll.u32 %s3887_s19, 4  ;;  %s3685_s12 = int_to_ptr.vmem [resolvable:$false] %s3684_s12 }
  0xdd   : > { %s3686_s1 = scalar_lea.vmem %s3685_s12, 7680  ;;  %p3687_p8 = scmp.lt.s32.totalorder %s4210_s27, %s3685_s12 }
  0xde   : > { %p3682_p1 = pnand %p3680_p12, %p5084_p13  ;;  %p3688_p0 = scmp.lt.s32.totalorder %s3686_s1, %s3679_s7 }
  0xe0   : > { %p3683_p4 = pneg %p3682_p1  ;;  %p3689_p9 = por %p3688_p0, %p3687_p8 }
  0xe2   : > { %p3690_p11 = pnand %p3689_p9, %p3683_p4 }
  0xe4   : > { %3693 = shalt.err (!%p3690_p11)
}
  0xe5   : > { %p5085_p7 = scmp.ne.s32.totalorder %s5076_s28, 0  ;;  %s2635_s26 = scalar_lea.hbm %s5009_s2, %s4113_s14 }
  0xe6   : > { %s451_s18 = scalar_lea.vmem [#allocation8], %s4117_s15  ;;  %s4245_s16 = scalar_lea.hbm %s2635_s26, 23040 }
  0xe7   : > { %3306 = dma.hbm_to_vmem [thread:$0]  (!%p5085_p7), %s4207_s24, 3840, %s4210_s27, %s4214_s30, %s5080_s23, %s5080_s23, %s5079_s4  }
  0xe8   : > { %s459_s29 = sshll.u32 %s451_s18, 4  ;;  %s3725_s25 = scalar_lea.hbm %s2635_s26, 26880  ;;  %s4247_s29 = int_to_ptr.vmem [resolvable:$true] %s459_s29 }
  0xe9   : > { %p3696_p2 = scmp.ne.s32.totalorder %s4245_s16, %s3725_s25  ;;  %s3700_s27 = scalar_lea.hbm %s5009_s2, 46080 }
  0xea   : > { %p3701_p3 = scmp.lt.u32.totalorder %s4245_s16, %s5009_s2  ;;  %p3702_p5 = scmp.lt.u32.totalorder %s3700_s27, %s3725_s25 }
  0xeb   : > { %p3698_p6 = pnand %p3696_p2, %p5084_p13  ;;  %p3704_p1 = scmp.lt.u32.totalorder %s3725_s25, %s4245_s16 }
  0xec   : > { %p3703_p12 = por %p3702_p5, %p3701_p3 }
  0xed   : > { %p3699_p10 = pneg %p3698_p6 }
  0xee   : > { %p3705_p4 = por %p3704_p1, %p3703_p12 }
  0xf0   : > { %p3706_p8 = pnand %p3705_p4, %p3699_p10 }
  0xf2   : > { %3709 = shalt.err (!%p3706_p8)
}
  0xf3   : > { %s3710_s17 = scalar_lea.vmem %s4247_s29, 3840  ;;  %s3888_s7 = smov [#allocation8]  }
  0xf4   : > { %p3711_p0 = scmp.ne.s32.totalorder %s4247_s29, %s3710_s17  ;;  %s3715_s19 = sshll.u32 %s3888_s7, 4  ;;  %s3716_s19 = int_to_ptr.vmem [resolvable:$false] %s3715_s19 }
  0xf5   : > { %s3717_s12 = scalar_lea.vmem %s3716_s19, 7680  ;;  %p3718_p2 = scmp.lt.s32.totalorder %s4247_s29, %s3716_s19 }
  0xf6   : > { %p3713_p9 = pnand %p3711_p0, %p5084_p13  ;;  %p3719_p6 = scmp.lt.s32.totalorder %s3717_s12, %s3710_s17 }
  0xf8   : > { %p3714_p11 = pneg %p3713_p9  ;;  %p3720_p3 = por %p3719_p6, %p3718_p2 }
  0xfa   : > { %p3721_p5 = pnand %p3720_p3, %p3714_p11 }
  0xfc   : > { %3724 = shalt.err (!%p3721_p5)
}
  0xfd   : > { %3312 = dma.hbm_to_vmem [thread:$0]  (!%p5085_p7), %s4245_s16, 3840, %s4247_s29, %s4135_s13, %s5080_s23, %s5080_s23, %s5079_s4  }
  0xfe   : > { %s2642_s22 = scalar_lea.hbm %s5010_s3, %s4113_s14  ;;  %s473_s18 = scalar_lea.vmem [#allocation9], %s4117_s15 }
  0xff   : > { %s4277_s26 = scalar_lea.hbm %s2642_s22, 30720  ;;  %s481_s25 = sshll.u32 %s473_s18, 4  ;;  %s4280_s25 = int_to_ptr.vmem [resolvable:$true] %s481_s25 }
 0x100   : > { %s5086_s10 = sand.u32 1, %s3875_s9   ;;  %s3756_s27 = scalar_lea.hbm %s2642_s22, 34560 }
 0x101   : > { %s4284_s24 = scalar_lea.sflag [#allocation10], %s5086_s10  ;;  %p3727_p10 = scmp.ne.s32.totalorder %s4277_s26, %s3756_s27 }
 0x102   : > { %s3731_s14 = scalar_lea.hbm %s5010_s3, 46080  ;;  %p3732_p4 = scmp.lt.u32.totalorder %s4277_s26, %s5010_s3 }
 0x103   : > { %p3729_p12 = pnand %p3727_p10, %p5084_p13  ;;  %p3733_p8 = scmp.lt.u32.totalorder %s3731_s14, %s3756_s27 }
 0x104   : > { %p3735_p9 = scmp.lt.u32.totalorder %s3756_s27, %s4277_s26 }
 0x105   : > { %p3730_p1 = pneg %p3729_p12  ;;  %p3734_p0 = por %p3733_p8, %p3732_p4 }
 0x107   : > { %p3736_p11 = por %p3735_p9, %p3734_p0 }
 0x109   : > { %p3737_p2 = pnand %p3736_p11, %p3730_p1 }
 0x10b   : > { %3740 = shalt.err (!%p3737_p2)
}
 0x10c   : > { %s3741_s15 = scalar_lea.vmem %s4280_s25, 3840  ;;  %s3889_s11 = smov [#allocation9]  }
 0x10d   : > { %p3742_p6 = scmp.ne.s32.totalorder %s4280_s25, %s3741_s15  ;;  %s3746_s17 = sshll.u32 %s3889_s11, 4  ;;  %s3747_s17 = int_to_ptr.vmem [resolvable:$false] %s3746_s17 }
 0x10e   : > { %s3748_s7 = scalar_lea.vmem %s3747_s17, 7680  ;;  %p3749_p10 = scmp.lt.s32.totalorder %s4280_s25, %s3747_s17 }
 0x10f   : > { %p3744_p3 = pnand %p3742_p6, %p5084_p13  ;;  %p3750_p12 = scmp.lt.s32.totalorder %s3748_s7, %s3741_s15 }
 0x111   : > { %p3745_p5 = pneg %p3744_p3  ;;  %p3751_p4 = por %p3750_p12, %p3749_p10 }
 0x113   : > { %p3752_p8 = pnand %p3751_p4, %p3745_p5 }
 0x115   : > { %3755 = shalt.err (!%p3752_p8)
}
 0x116   : > { %3315 = dma.hbm_to_vmem [thread:$0]  (!%p5085_p7), %s4277_s26, 3840, %s4280_s25, %s4284_s24, %s5080_s23, %s5080_s23, %s5079_s4  }
 0x117   : > { %s5087_s5 = sld [smem:[#allocation34_spill]] }
 0x11d   : > { %p5088_p13 = scmp.ne.s32.totalorder %s5087_s5, 0 }
 0x11f   : > { %493 = sbr.rel (%p5088_p13) target bundleno = 1331 (0x533), region = 60 }
 0x126   : > { %s5089_s19 = sld [smem:[#allocation30_spill]]  ;;  %s5090_s12 = sld [smem:[#allocation32_spill]] }
 0x12c   : > { %s4313_s1 = sand.u32 1, %s5089_s19   ;;  %p5091_p1 = scmp.ne.s32.totalorder %s5090_s12, 0 }
 0x12d   : > { %s4316_s20 = smul.u32 240, %s4313_s1  ;;  %s496_s28 = scalar_lea.sflag [#allocation4], %s4313_s1 }
 0x12f   : > { %s4320_s22 = scalar_lea.vmem [#allocation3], %s4316_s20 }
 0x130   : > { %3830 = dma.done.wait (%p5091_p1), %s496_s28, 3840  }
 0x131   : > { %3832 = vsyncadd (%p5091_p1), %s496_s28, 4294963456  ;;  %s5092_s4 = sld [smem:[#allocation31_spill]]  ;;  %s4328_s18 = scalar_lea.vmem [#allocation6], %s4316_s20 }
 0x137   : > { %s504_s23 = sand.u32 1, %s5092_s4  }
 0x138   : > { %s505_s26 = scalar_lea.sflag [#allocation7], %s504_s23 }
 0x139   : > { %3834 = dma.done.wait (%p5091_p1), %s505_s26, 7680  }
 0x13a   : > { %3836 = vsyncadd (%p5091_p1), %s505_s26, 4294959616  ;;  %s4335_s25 = scalar_lea.vmem [#allocation8], %s4316_s20  ;;  %s523_s10 = scalar_lea.sflag [#allocation10], %s504_s23 }
 0x13b   : > { %s4338_s24 = scalar_lea.vmem [#allocation9], %s4316_s20 }
 0x13c   : > { %3838 = dma.done.wait (%p5091_p1), %s523_s10, 3840  }
 0x13d   : > { %3840 = vsyncadd (%p5091_p1), %s523_s10, 4294963456  ;;  %p5093_p7 = scmp.eq.s32.totalorder %s5092_s4, 0 }
 0x13f   : > { %3842 = dma.done.wait (%p5093_p7), [#allocation10], 8192   ;;  %p5094_p0 = pmov %p5093_p7 }
 0x141   : > { %3844 = vsyncadd (%p5094_p0), [#allocation10], 4294959104  ;;  %p5095_p9 = pmov %p5094_p0 }
 0x142   : > { %p5096_p11 = pmov %p5094_p0 }
 0x143   : > { %3846 = dma.done.wait (%p5095_p9), [#allocation13], 2080  }
 0x144   : > { %3848 = vsyncadd (%p5096_p11), [#allocation13], 4294965216  ;;  %p5097_p2 = pmov %p5094_p0 }
 0x145   : > { %p5098_p6 = pmov %p5094_p0 }
 0x146   : > { %3850 = dma.done.wait (%p5097_p2), [#allocation16], 272  }
 0x147   : > { %3852 = vsyncadd (%p5098_p6), [#allocation16], 4294967024  ;;  %v3890_v1 = vmov 0   ;;  %v4359_v2 = vld [vmem:[#allocation11 + $0x4] ss:$8 sps:$4 sm:$0xff]   ;;  %vm2462_vm0 = vcmask 916480  }
 0x148   : > { %1109 = vmatprep.mubr.bf16.mxu0 %v3890_v1  ;;  %846 = vmatprep.mubr.bf16.mxu1 %v3890_v1  ;;  %v4361_v3 = vld [vmem:[#allocation11] ss:$8 sps:$4 sm:$0xff]   ;;  %v4364_v4 = vld [vmem:[#allocation11 + $0x14] ss:$8 sps:$4 sm:$0xff]   ;;  %v4367_v5 = vld [vmem:[#allocation11 + $0x10] ss:$8 sps:$4 sm:$0xff]  }
 0x149   : > { %3380 = vset.pattern.permute.xlu0 %v3890_v1  ;;  %1077 = vmatprep.subr.bf16.mxu0 %v4359_v2  ;;  %v4370_v6 = vld [vmem:[#allocation11 + $0x24] ss:$8 sps:$4 sm:$0xff]   ;;  %v4373_v7 = vld [vmem:[#allocation11 + $0x20] ss:$8 sps:$4 sm:$0xff]   ;;  %v4376_v8 = vld [vmem:[#allocation11 + $0x34] ss:$8 sps:$4 sm:$0xff]  }
 0x14a   : > { %1078 = vmatpush1.bf16.msra.mxu0 %v4361_v3  ;;  %v4379_v9 = vld [vmem:[#allocation11 + $0x30] ss:$8 sps:$4 sm:$0xff]   ;;  %v4382_v10 = vld [vmem:[#allocation11 + $0x44] ss:$8 sps:$4 sm:$0xff]   ;;  %v4385_v11 = vld [vmem:[#allocation11 + $0x40] ss:$8 sps:$4 sm:$0xff]  }
 0x14b   : > { %1079 = vmatprep.subr.bf16.mxu0 %v4364_v4  ;;  %v4388_v12 = vld [vmem:[#allocation11 + $0x54] ss:$8 sps:$4 sm:$0xff]   ;;  %v4391_v13 = vld [vmem:[#allocation11 + $0x50] ss:$8 sps:$4 sm:$0xff]   ;;  %v4394_v14 = vld [vmem:[#allocation11 + $0x64] ss:$8 sps:$4 sm:$0xff]  }
 0x14c   : > { %v3420_v15 = vld [vmem:[#allocation11 + $0x84] ss:$8 sps:$4 sm:$0xff]   ;;  %v3422_v16 = vld [vmem:[#allocation11 + $0x80] ss:$8 sps:$4 sm:$0xff]   ;;  %v4399_v18 = vld [vmem:[#allocation11 + $0x74] ss:$8 sps:$4 sm:$0xff]  }
 0x14d   : > { %v4396_v17 = vld [vmem:[#allocation11 + $0x60] ss:$8 sps:$4 sm:$0xff]   ;;  %814 = vmatprep.subr.bf16.mxu1 %v3420_v15  ;;  %v3423_v19 = vld [vmem:[#allocation11 + $0x94] ss:$8 sps:$4 sm:$0xff]   ;;  %v3425_v20 = vld [vmem:[#allocation11 + $0x90] ss:$8 sps:$4 sm:$0xff]  }
 0x14e   : > { %1080 = vmatpush1.bf16.msra.mxu0 %v4367_v5  ;;  %815 = vmatpush1.bf16.msra.mxu1 %v3422_v16  ;;  %v4402_v21 = vld [vmem:[#allocation11 + $0x70] ss:$8 sps:$4 sm:$0xff]   ;;  %v3429_v23 = vld [vmem:[#allocation11 + $0xa4] ss:$8 sps:$4 sm:$0xff]   ;;  %v3431_v26 = vld [vmem:[#allocation11 + $0xa0] ss:$8 sps:$4 sm:$0xff]  }
 0x14f   : > { %1081 = vmatprep.subr.bf16.mxu0 %v4370_v6  ;;  %816 = vmatprep.subr.bf16.mxu1 %v3423_v19  ;;  %v611_v22 = vld [vmem:[%s4320_s22] sm:$0xff]  ;;  %v612_v24 = vld [vmem:[%s4320_s22 + $0x8] sm:$0xff]  ;;  %v613_v33 = vld [vmem:[%s4320_s22 + $0x10] sm:$0xff]  ;;  %s4850_s27 = scalar_lea.vmem [#allocation18], %s4316_s20  ;;  %s5117_s13 = sld [smem:[#allocation37_spill]] }
 0x150   : > { %v3407_v25 = vld [vmem:[#allocation11 + $0x104] ss:$8 sps:$4 sm:$0xff]   ;;  %v3432_v27 = vld [vmem:[#allocation11 + $0xb4] ss:$8 sps:$4 sm:$0xff]   ;;  %v641_v28 = vpack.c.bf16 %v612_v24, %v611_v22  ;;  %v3405_v29 = vld [vmem:[#allocation11 + $0x100] ss:$8 sps:$4 sm:$0xff]  }
 0x151   : > { %v3410_v30 = vld [vmem:[#allocation11 + $0x114] ss:$8 sps:$4 sm:$0xff]   ;;  %v3434_v31 = vld [vmem:[#allocation11 + $0xb0] ss:$8 sps:$4 sm:$0xff]   ;;  %v3438_v32 = vld [vmem:[#allocation11 + $0xc4] ss:$8 sps:$4 sm:$0xff]  }
 0x152   : > { %1082 = vmatpush1.bf16.msra.mxu0 %v4373_v7  ;;  %817 = vmatpush1.bf16.msra.mxu1 %v3425_v20  ;;  %v614_v34 = vld [vmem:[%s4320_s22 + $0x18] sm:$0xff]  ;;  %v615_v44 = vld [vmem:[%s4320_s22 + $0x20] sm:$0xff]  ;;  %v616_v45 = vld [vmem:[%s4320_s22 + $0x28] sm:$0xff]  ;;  %s2902_s29 = smul.u32 3840, %s5092_s4  ;;  %s2556_s14 = sshll.u32 %s4850_s27, 4  ;;  %s4932_s14 = int_to_ptr.vmem [resolvable:$true] %s2556_s14 }
 0x153   : > { %1083 = vmatprep.subr.bf16.mxu0 %v4376_v8  ;;  %818 = vmatprep.subr.bf16.mxu1 %v3429_v23  ;;  %v3408_v35 = vld [vmem:[#allocation11 + $0x110] ss:$8 sps:$4 sm:$0xff]   ;;  %v3413_v36 = vld [vmem:[#allocation11 + $0x124] ss:$8 sps:$4 sm:$0xff]   ;;  %v3440_v37 = vld [vmem:[#allocation11 + $0xc0] ss:$8 sps:$4 sm:$0xff]   ;;  %v642_v39 = vpack.c.bf16 %v614_v34, %v613_v33  ;;  %v643_v50 = vpack.c.bf16 %v616_v45, %v615_v44 }
 0x154   : > { %v3441_v38 = vld [vmem:[#allocation11 + $0xd4] ss:$8 sps:$4 sm:$0xff]   ;;  %v3411_v40 = vld [vmem:[#allocation11 + $0x120] ss:$8 sps:$4 sm:$0xff]   ;;  %v3443_v42 = vld [vmem:[#allocation11 + $0xd0] ss:$8 sps:$4 sm:$0xff]  }
 0x155   : > { %v3416_v41 = vld [vmem:[#allocation11 + $0x134] ss:$8 sps:$4 sm:$0xff]   ;;  %v3447_v43 = vld [vmem:[#allocation11 + $0xe4] ss:$8 sps:$4 sm:$0xff]   ;;  %v3414_v46 = vld [vmem:[#allocation11 + $0x130] ss:$8 sps:$4 sm:$0xff]  }
 0x156   : > { %1084 = vmatpush1.bf16.msra.mxu0 %v4379_v9  ;;  %819 = vmatpush1.bf16.msra.mxu1 %v3431_v26  ;;  %v3419_v47 = vld [vmem:[#allocation11 + $0x144] ss:$8 sps:$4 sm:$0xff]   ;;  %v3449_v48 = vld [vmem:[#allocation11 + $0xe0] ss:$8 sps:$4 sm:$0xff]   ;;  %v3450_v49 = vld [vmem:[#allocation11 + $0xf4] ss:$8 sps:$4 sm:$0xff]  }
 0x157   : > { %1085 = vmatprep.subr.bf16.mxu0 %v4382_v10  ;;  %820 = vmatprep.subr.bf16.mxu1 %v3432_v27  ;;  %v3417_v51 = vld [vmem:[#allocation11 + $0x140] ss:$8 sps:$4 sm:$0xff]   ;;  %v3428_v52 = vld [vmem:[#allocation11 + $0x154] ss:$8 sps:$4 sm:$0xff]   ;;  %v3452_v53 = vld [vmem:[#allocation11 + $0xf0] ss:$8 sps:$4 sm:$0xff]  }
 0x158   : > { %v672_v54 = vld [vmem:[%s4328_s18] sm:$0xff]  ;;  %v673_v55 = vld [vmem:[%s4328_s18 + $0x8] sm:$0xff]  ;;  %v617_v56 = vld [vmem:[%s4320_s22 + $0x30] sm:$0xff]  ;;  %s5118_s15 = sld [smem:[#allocation51_spill]]  ;;  %s2538_s17 = scalar_lea.sflag [#allocation5], %s4313_s1 }
 0x159   : > { %v618_v57 = vld [vmem:[%s4320_s22 + $0x38] sm:$0xff]  ;;  %v702_v59 = vpack.c.bf16 %v673_v55, %v672_v54  ;;  %v674_v0 = vld [vmem:[%s4328_s18 + $0x10] sm:$0xff]  ;;  %v620_v16 = vld [vmem:[%s4320_s22 + $0x48] sm:$0xff]  ;;  %s3757_s7 = scalar_lea.vmem %s4932_s14, 3840  ;;  %p5119_p5 = scmp.ne.s32.totalorder %s5117_s13, 0 }
 0x15a   : > { %1086 = vmatpush1.bf16.msra.mxu0 %v4385_v11  ;;  %821 = vmatpush1.bf16.msra.mxu1 %v3434_v31  ;;  %v3426_v58 = vld [vmem:[#allocation11 + $0x150] ss:$8 sps:$4 sm:$0xff]   ;;  %v3437_v60 = vld [vmem:[#allocation11 + $0x164] ss:$8 sps:$4 sm:$0xff]   ;;  %v644_v61 = vpack.c.bf16 %v618_v57, %v617_v56  ;;  %v3435_v62 = vld [vmem:[#allocation11 + $0x160] ss:$8 sps:$4 sm:$0xff]   ;;  %p3758_p3 = scmp.ne.s32.totalorder %s4932_s14, %s3757_s7 }
 0x15b   : > { %1087 = vmatprep.subr.bf16.mxu0 %v4388_v12  ;;  %822 = vmatprep.subr.bf16.mxu1 %v3438_v32  ;;  %v3446_v63 = vld [vmem:[#allocation11 + $0x174] ss:$8 sps:$4 sm:$0xff]   ;;  %v3444_v19 = vld [vmem:[#allocation11 + $0x170] ss:$8 sps:$4 sm:$0xff]   ;;  %v3455_v22 = vld [vmem:[#allocation11 + $0x184] ss:$8 sps:$4 sm:$0xff]  }
 0x15c   : > { %v675_v15 = vld [vmem:[%s4328_s18 + $0x18] sm:$0xff]  ;;  %v676_v24 = vld [vmem:[%s4328_s18 + $0x20] sm:$0xff]  ;;  %v678_v26 = vld [vmem:[%s4328_s18 + $0x30] sm:$0xff]  ;;  %p3759_p10 = pnand %p3758_p3, %p5119_p5  ;;  %s3892_s5 = smov [#allocation18]  }
 0x15d   : > { %v703_v20 = vpack.c.bf16 %v675_v15, %v674_v0  ;;  %v679_v27 = vld [vmem:[%s4328_s18 + $0x38] sm:$0xff]  ;;  %v686_v45 = vld [vmem:[%s4328_s18 + $0x70] sm:$0xff]  ;;  %v688_v54 = vld [vmem:[%s4328_s18 + $0x80] sm:$0xff]  ;;  %s3761_s19 = sshll.u32 %s3892_s5, 4  ;;  %s3762_s19 = int_to_ptr.vmem [resolvable:$false] %s3761_s19 }
 0x15e   : > { %1088 = vmatpush1.bf16.msra.mxu0 %v4391_v13  ;;  %823 = vmatpush1.bf16.msra.mxu1 %v3440_v37  ;;  %v683_v31 = vld [vmem:[%s4328_s18 + $0x58] sm:$0xff]  ;;  %v1262_v37 = vld [vmem:[%s4335_s25 + $0x10] sm:$0xff]  ;;  %v689_v55 = vld [vmem:[%s4328_s18 + $0x88] sm:$0xff]  ;;  %s4930_s11 = scalar_lea.hbm %s5118_s15, %s2902_s29  ;;  %p3760_p12 = pneg %p3759_p10 }
 0x15f   : > { %1089 = vmatprep.subr.bf16.mxu0 %v4394_v14  ;;  %824 = vmatprep.subr.bf16.mxu1 %v3441_v38  ;;  %v3453_v34 = vld [vmem:[#allocation11 + $0x180] ss:$8 sps:$4 sm:$0xff]   ;;  %v3464_v44 = vld [vmem:[#allocation11 + $0x1b4] ss:$8 sps:$4 sm:$0xff]   ;;  %s3763_s12 = scalar_lea.vmem %s3762_s19, 7680  ;;  %p3764_p4 = scmp.lt.s32.totalorder %s4932_s14, %s3762_s19 }
 0x160   : > { %v1263_v38 = vld [vmem:[%s4335_s25 + $0x18] sm:$0xff]  ;;  %v1266_v57 = vld [vmem:[%s4335_s25 + $0x30] sm:$0xff]  ;;  %p3765_p8 = scmp.lt.s32.totalorder %s3763_s12, %s3757_s7 }
 0x161   : > { %v3470_v56 = vld [vmem:[#allocation11 + $0x1d4] ss:$8 sps:$4 sm:$0xff]  }
 0x162   : > { %1090 = vmatpush1.bf16.msra.mxu0 %v4396_v17  ;;  %825 = vmatpush1.bf16.msra.mxu1 %v3443_v42  ;;  %v1291_v42 = vpack.c.bf16 %v1263_v38, %v1262_v37  ;;  %v690_v0 = vld [vmem:[%s4328_s18 + $0x90] sm:$0xff]  ;;  %v691_v15 = vld [vmem:[%s4328_s18 + $0x98] sm:$0xff]  ;;  %p3766_p13 = por %p3765_p8, %p3764_p4 }
 0x163   : > { %1091 = vmatprep.subr.bf16.mxu0 %v4399_v18  ;;  %826 = vmatprep.subr.bf16.mxu1 %v3447_v43  ;;  %v3459_v43 = vld [vmem:[#allocation11 + $0x1a0] ss:$8 sps:$4 sm:$0xff]  }
 0x164   : > { %p3767_p1 = pnand %p3766_p13, %p3760_p12 }
 0x166   : > { %1092 = vmatpush1.bf16.msra.mxu0 %v4402_v21  ;;  %827 = vmatpush1.bf16.msra.mxu1 %v3449_v48  ;;  %v1265_v48 = vld [vmem:[%s4335_s25 + $0x28] sm:$0xff] }
 0x167   : > { %1402 = vmatprep.subr.bf16.mxu0 %v3407_v25  ;;  %828 = vmatprep.subr.bf16.mxu1 %v3450_v49  ;;  %v3462_v49 = vld [vmem:[#allocation11 + $0x1b0] ss:$8 sps:$4 sm:$0xff]  }
 0x169   : > { %1110 = vmatmul.mubr.bf16.vlgmr.msra.gmra.mrb[0].mxu0 %v641_v28 }
 0x16a   : > { %1403 = vmatpush1.bf16.msra.mxu0 %v3405_v29  ;;  %1119 = vmatprep.mubr.bf16.mxu0 %v3890_v1 }
 0x16b   : > { %1404 = vmatprep.subr.bf16.mxu0 %v3410_v30  ;;  %829 = vmatpush1.bf16.msra.mxu1 %v3452_v53  ;;  %v682_v30 = vld [vmem:[%s4328_s18 + $0x50] sm:$0xff] }
 0x16c   : > { %3054 = vmatprep.subr.bf16.mxu1 %v4359_v2  ;;  %v619_v2 = vld [vmem:[%s4320_s22 + $0x40] sm:$0xff]  ;;  %v707_v32 = vpack.c.bf16 %v683_v31, %v682_v30  ;;  %v698_v30 = vld [vmem:[%s4328_s18 + $0xd0] sm:$0xff]  ;;  %v699_v31 = vld [vmem:[%s4328_s18 + $0xd8] sm:$0xff] }
 0x16d   : > { %v645_v23 = vpack.c.bf16 %v620_v16, %v619_v2  ;;  %v3465_v53 = vld [vmem:[#allocation11 + $0x1c0] ss:$8 sps:$4 sm:$0xff]   ;;  %v3476_v2 = vld [vmem:[#allocation11 + $0x1f4] ss:$8 sps:$4 sm:$0xff]  }
 0x16e   : > { %1405 = vmatpush1.bf16.msra.mxu0 %v3408_v35  ;;  %847 = vmatmul.mubr.bf16.vlgmr.msra.gmra.mrb[0].mxu1 %v702_v59  ;;  %v684_v35 = vld [vmem:[%s4328_s18 + $0x60] sm:$0xff]  ;;  %v710_v59 = vpack.c.bf16 %v689_v55, %v688_v54  ;;  %v1285_v54 = vld [vmem:[%s4335_s25 + $0xc8] sm:$0xff] }
 0x16f   : > { %1406 = vmatprep.subr.bf16.mxu0 %v3413_v36  ;;  %856 = vmatprep.mubr.bf16.mxu1 %v3890_v1  ;;  %v685_v36 = vld [vmem:[%s4328_s18 + $0x68] sm:$0xff]  ;;  %v1268_v16 = vld [vmem:[%s4335_s25 + $0x40] sm:$0xff] }
 0x170   : > { %3062 = vmatpush1.bf16.msra.mxu1 %v4361_v3  ;;  %v677_v3 = vld [vmem:[%s4328_s18 + $0x28] sm:$0xff] }
 0x171   : > { %1120 = vmatmul.mubr.bf16.gmra.mrb[4].mxu0 %v642_v39  ;;  %3055 = vmatprep.subr.bf16.mxu1 %v4364_v4  ;;  %v621_v4 = vld [vmem:[%s4320_s22 + $0x50] sm:$0xff]  ;;  %v704_v25 = vpack.c.bf16 %v677_v3, %v676_v24  ;;  %v692_v24 = vld [vmem:[%s4328_s18 + $0xa0] sm:$0xff]  ;;  %v693_v3 = vld [vmem:[%s4328_s18 + $0xa8] sm:$0xff] }
 0x172   : > { %1129 = vmatprep.mubr.bf16.mxu0 %v3890_v1  ;;  %1407 = vmatpush1.bf16.msra.mxu0 %v3411_v40  ;;  %v3456_v39 = vld [vmem:[#allocation11 + $0x190] ss:$8 sps:$4 sm:$0xff]   ;;  %v708_v40 = vpack.c.bf16 %v685_v36, %v684_v35 }
 0x173   : > { %1408 = vmatprep.subr.bf16.mxu0 %v3416_v41  ;;  %v3461_v41 = vld [vmem:[#allocation11 + $0x1a4] ss:$8 sps:$4 sm:$0xff]  }
 0x174   : > { %3063 = vmatpush1.bf16.msra.mxu1 %v4367_v5  ;;  %v622_v5 = vld [vmem:[%s4320_s22 + $0x58] sm:$0xff]  ;;  %v1278_v35 = vld [vmem:[%s4335_s25 + $0x90] sm:$0xff] }
 0x175   : > { %3056 = vmatprep.subr.bf16.mxu1 %v4370_v6  ;;  %v646_v6 = vpack.c.bf16 %v622_v5, %v621_v4  ;;  %v1270_v4 = vld [vmem:[%s4335_s25 + $0x50] sm:$0xff]  ;;  %v1271_v5 = vld [vmem:[%s4335_s25 + $0x58] sm:$0xff] }
 0x176   : > { %1409 = vmatpush1.bf16.msra.mxu0 %v3414_v46  ;;  %857 = vmatmul.mubr.bf16.gmra.mrb[4].mxu1 %v703_v20  ;;  %v687_v46 = vld [vmem:[%s4328_s18 + $0x78] sm:$0xff]  ;;  %v711_v20 = vpack.c.bf16 %v691_v15, %v690_v0  ;;  %v636_v0 = vld [vmem:[%s4320_s22 + $0xc8] sm:$0xff] }
 0x177   : > { %1410 = vmatprep.subr.bf16.mxu0 %v3419_v47  ;;  %866 = vmatprep.mubr.bf16.mxu1 %v3890_v1  ;;  %v1264_v47 = vld [vmem:[%s4335_s25 + $0x20] sm:$0xff]  ;;  %v1279_v36 = vld [vmem:[%s4335_s25 + $0x98] sm:$0xff] }
 0x178   : > { %3064 = vmatpush1.bf16.msra.mxu1 %v4373_v7  ;;  %v623_v7 = vld [vmem:[%s4320_s22 + $0x60] sm:$0xff]  ;;  %v1299_v38 = vpack.c.bf16 %v1279_v36, %v1278_v35 }
 0x179   : > { %1130 = vmatmul.mubr.bf16.gmra.mrb[8].mxu0 %v643_v50  ;;  %3057 = vmatprep.subr.bf16.mxu1 %v4376_v8  ;;  %v624_v8 = vld [vmem:[%s4320_s22 + $0x68] sm:$0xff]  ;;  %v709_v50 = vpack.c.bf16 %v687_v46, %v686_v45  ;;  %v629_v45 = vld [vmem:[%s4320_s22 + $0x90] sm:$0xff]  ;;  %v630_v46 = vld [vmem:[%s4320_s22 + $0x98] sm:$0xff] }
 0x17a   : > { %1139 = vmatprep.mubr.bf16.mxu0 %v3890_v1  ;;  %1411 = vmatpush1.bf16.msra.mxu0 %v3417_v51  ;;  %v647_v28 = vpack.c.bf16 %v624_v8, %v623_v7  ;;  %v3467_v51 = vld [vmem:[#allocation11 + $0x1c4] ss:$8 sps:$4 sm:$0xff]  }
 0x17b   : > { %1412 = vmatprep.subr.bf16.mxu0 %v3428_v52  ;;  %v1292_v52 = vpack.c.bf16 %v1265_v48, %v1264_v47  ;;  %v1272_v7 = vld [vmem:[%s4335_s25 + $0x60] sm:$0xff]  ;;  %v1273_v8 = vld [vmem:[%s4335_s25 + $0x68] sm:$0xff]  ;;  %v1282_v47 = vld [vmem:[%s4335_s25 + $0xb0] sm:$0xff] }
 0x17c   : > { %3065 = vmatpush1.bf16.msra.mxu1 %v4379_v9  ;;  %v705_v9 = vpack.c.bf16 %v679_v27, %v678_v26  ;;  %v694_v26 = vld [vmem:[%s4328_s18 + $0xb0] sm:$0xff]  ;;  %v695_v27 = vld [vmem:[%s4328_s18 + $0xb8] sm:$0xff]  ;;  %v1653_v36 = vld [vmem:[%s4338_s24 + $0x40] sm:$0xff] }
 0x17d   : > { %3058 = vmatprep.subr.bf16.mxu1 %v4382_v10  ;;  %v680_v10 = vld [vmem:[%s4328_s18 + $0x40] sm:$0xff]  ;;  %v1283_v48 = vld [vmem:[%s4335_s25 + $0xb8] sm:$0xff] }
 0x17e   : > { %1413 = vmatpush1.bf16.msra.mxu0 %v3426_v58  ;;  %867 = vmatmul.mubr.bf16.gmra.mrb[8].mxu1 %v704_v25  ;;  %v1267_v58 = vld [vmem:[%s4335_s25 + $0x38] sm:$0xff]  ;;  %v712_v25 = vpack.c.bf16 %v693_v3, %v692_v24 }
 0x17f   : > { %1414 = vmatprep.subr.bf16.mxu0 %v3437_v60  ;;  %876 = vmatprep.mubr.bf16.mxu1 %v3890_v1  ;;  %v3468_v60 = vld [vmem:[#allocation11 + $0x1d0] ss:$8 sps:$4 sm:$0xff]   ;;  %v3477_v15 = vld [vmem:[#allocation14 + $0x40] sm:$0xff]  }
 0x180   : > { %3066 = vmatpush1.bf16.msra.mxu1 %v4385_v11  ;;  %v681_v11 = vld [vmem:[%s4328_s18 + $0x48] sm:$0xff] }
 0x181   : > { %1140 = vmatmul.mubr.bf16.gmra.mrb[12].mxu0 %v644_v61  ;;  %3059 = vmatprep.subr.bf16.mxu1 %v4388_v12  ;;  %v625_v12 = vld [vmem:[%s4320_s22 + $0x70] sm:$0xff]  ;;  %v706_v29 = vpack.c.bf16 %v681_v11, %v680_v10  ;;  %v696_v10 = vld [vmem:[%s4328_s18 + $0xc0] sm:$0xff]  ;;  %v697_v11 = vld [vmem:[%s4328_s18 + $0xc8] sm:$0xff] }
 0x182   : > { %1149 = vmatprep.mubr.bf16.mxu0 %v3890_v1  ;;  %1415 = vmatpush1.bf16.msra.mxu0 %v3435_v62  ;;  %v3473_v61 = vld [vmem:[#allocation11 + $0x1e4] ss:$8 sps:$4 sm:$0xff]   ;;  %v1293_v62 = vpack.c.bf16 %v1267_v58, %v1266_v57  ;;  %v3481_v3 = vld [vmem:[#allocation14 + $0x50] sm:$0xff]  }
 0x183   : > { %1416 = vmatprep.subr.bf16.mxu0 %v3446_v63  ;;  %v3471_v63 = vld [vmem:[#allocation11 + $0x1e0] ss:$8 sps:$4 sm:$0xff]  }
 0x184   : > { %3067 = vmatpush1.bf16.msra.mxu1 %v4391_v13  ;;  %v626_v13 = vld [vmem:[%s4320_s22 + $0x78] sm:$0xff]  ;;  %v633_v57 = vld [vmem:[%s4320_s22 + $0xb0] sm:$0xff] }
 0x185   : > { %3060 = vmatprep.subr.bf16.mxu1 %v4394_v14  ;;  %v648_v14 = vpack.c.bf16 %v626_v13, %v625_v12  ;;  %v1274_v12 = vld [vmem:[%s4335_s25 + $0x70] sm:$0xff]  ;;  %v1275_v13 = vld [vmem:[%s4335_s25 + $0x78] sm:$0xff] }
 0x186   : > { %1417 = vmatpush1.bf16.msra.mxu0 %v3444_v19  ;;  %877 = vmatmul.mubr.bf16.gmra.mrb[12].mxu1 %v705_v9  ;;  %v1269_v19 = vld [vmem:[%s4335_s25 + $0x48] sm:$0xff]  ;;  %v713_v9 = vpack.c.bf16 %v695_v27, %v694_v26  ;;  %v634_v58 = vld [vmem:[%s4320_s22 + $0xb8] sm:$0xff]  ;;  %v1645_v26 = vld [vmem:[%s4338_s24] sm:$0xff] }
 0x187   : > { %1787 = vmatprep.subr.bf16.mxu0 %v3455_v22  ;;  %886 = vmatprep.mubr.bf16.mxu1 %v3890_v1  ;;  %v3474_v22 = vld [vmem:[#allocation11 + $0x1f0] ss:$8 sps:$4 sm:$0xff]  }
 0x188   : > { %3068 = vmatpush1.bf16.msra.mxu1 %v4396_v17  ;;  %v1260_v17 = vld [vmem:[%s4335_s25] sm:$0xff]  ;;  %v1646_v27 = vld [vmem:[%s4338_s24 + $0x8] sm:$0xff] }
 0x189   : > { %1150 = vmatmul.mubr.bf16.gmra.mrb[16].mxu0 %v645_v23  ;;  %3061 = vmatprep.subr.bf16.mxu1 %v4399_v18  ;;  %v1261_v18 = vld [vmem:[%s4335_s25 + $0x8] sm:$0xff]  ;;  %v1294_v23 = vpack.c.bf16 %v1269_v19, %v1268_v16  ;;  %v1288_v19 = vld [vmem:[%s4335_s25 + $0xe0] sm:$0xff] }
 0x18a   : > { %1159 = vmatprep.mubr.bf16.mxu0 %v3890_v1  ;;  %v1290_v33 = vpack.c.bf16 %v1261_v18, %v1260_v17  ;;  %v1276_v17 = vld [vmem:[%s4335_s25 + $0x80] sm:$0xff]  ;;  %v1277_v18 = vld [vmem:[%s4335_s25 + $0x88] sm:$0xff] }
 0x18b   : > { %v3479_v16 = vld [vmem:[#allocation14 + $0x48] sm:$0xff]  }
 0x18c   : > { %3069 = vmatpush1.bf16.msra.mxu1 %v4402_v21  ;;  %v3458_v21 = vld [vmem:[#allocation11 + $0x194] ss:$8 sps:$4 sm:$0xff]  }
 0x18d   : > { %2903 = vmatprep.subr.bf16.mxu1 %v3477_v15 }
 0x18e   : > { %887 = vmatmul.mubr.bf16.gmra.mrb[16].mxu1 %v706_v29  ;;  %v714_v29 = vpack.c.bf16 %v697_v11, %v696_v10  ;;  %v639_v10 = vld [vmem:[%s4320_s22 + $0xe0] sm:$0xff]  ;;  %v640_v11 = vld [vmem:[%s4320_s22 + $0xe8] sm:$0xff] }
 0x18f   : > { %896 = vmatprep.mubr.bf16.mxu1 %v3890_v1 }
 0x191   : > { %1160 = vmatmul.mubr.bf16.gmra.mrb[20].mxu0 %v646_v6  ;;  %v1295_v6 = vpack.c.bf16 %v1271_v5, %v1270_v4  ;;  %v637_v4 = vld [vmem:[%s4320_s22 + $0xd0] sm:$0xff]  ;;  %v638_v5 = vld [vmem:[%s4320_s22 + $0xd8] sm:$0xff] }
 0x192   : > { %1169 = vmatprep.mubr.bf16.mxu0 %v3890_v1 }
 0x196   : > { %897 = vmatmul.mubr.bf16.gmra.mrb[20].mxu1 %v707_v32  ;;  %v715_v32 = vpack.c.bf16 %v699_v31, %v698_v30  ;;  %v655_v30 = vpack.c.bf16 %v640_v11, %v639_v10  ;;  %v3488_v31 = vld [vmem:[#allocation14 + $0x28] sm:$0xff]  }
 0x197   : > { %906 = vmatprep.mubr.bf16.mxu1 %v3890_v1  ;;  %v1669_v10 = vld [vmem:[%s4338_s24 + $0xc0] sm:$0xff]  ;;  %v1670_v11 = vld [vmem:[%s4338_s24 + $0xc8] sm:$0xff] }
 0x199   : > { %1170 = vmatmul.mubr.bf16.gmra.mrb[24].mxu0 %v647_v28  ;;  %v1296_v28 = vpack.c.bf16 %v1273_v8, %v1272_v7  ;;  %v654_v7 = vpack.c.bf16 %v638_v5, %v637_v4  ;;  %v3484_v8 = vld [vmem:[#allocation14 + $0x18] sm:$0xff]  }
 0x19a   : > { %1179 = vmatprep.mubr.bf16.mxu0 %v3890_v1  ;;  %v1667_v4 = vld [vmem:[%s4338_s24 + $0xb0] sm:$0xff]  ;;  %v1668_v5 = vld [vmem:[%s4338_s24 + $0xb8] sm:$0xff] }
 0x19e   : > { %907 = vmatmul.mubr.bf16.gmra.mrb[24].mxu1 %v708_v40  ;;  %v628_v40 = vld [vmem:[%s4320_s22 + $0x88] sm:$0xff] }
 0x19f   : > { %916 = vmatprep.mubr.bf16.mxu1 %v3890_v1 }
 0x1a1   : > { %1180 = vmatmul.mubr.bf16.gmra.mrb[28].mxu0 %v648_v14  ;;  %v1297_v14 = vpack.c.bf16 %v1275_v13, %v1274_v12  ;;  %v3486_v12 = vld [vmem:[#allocation14 + $0x20] sm:$0xff]   ;;  %v3487_v13 = vld [vmem:[#allocation14 + $0x68] sm:$0xff]  }
 0x1a2   : > { %1434 = vmatprep.mubr.bf16.mxu0 %v3890_v1 }
 0x1a6   : > { %917 = vmatmul.mubr.bf16.gmra.mrb[28].mxu1 %v709_v50  ;;  %v1301_v50 = vpack.c.bf16 %v1283_v48, %v1282_v47  ;;  %v1660_v47 = vld [vmem:[%s4338_s24 + $0x78] sm:$0xff] }
 0x1a7   : > { %926 = vmatprep.mubr.bf16.mxu1 %v3890_v1 }
 0x1a9   : > { %1435 = vmatmul.mubr.bf16.vlgmr.msra.gmra.mrb[0].mxu0 %v1290_v33  ;;  %v1298_v33 = vpack.c.bf16 %v1277_v18, %v1276_v17  ;;  %v1649_v18 = vld [vmem:[%s4338_s24 + $0x20] sm:$0xff] }
 0x1aa   : > { %1788 = vmatpush1.bf16.msra.mxu0 %v3453_v34  ;;  %1444 = vmatprep.mubr.bf16.mxu0 %v3890_v1  ;;  %v700_v34 = vld [vmem:[%s4328_s18 + $0xe0] sm:$0xff] }
 0x1ab   : > { %1789 = vmatprep.subr.bf16.mxu0 %v3458_v21  ;;  %v701_v21 = vld [vmem:[%s4328_s18 + $0xe8] sm:$0xff] }
 0x1ac   : > { %v716_v37 = vpack.c.bf16 %v701_v21, %v700_v34  ;;  %v1651_v34 = vld [vmem:[%s4338_s24 + $0x30] sm:$0xff]  ;;  %v1652_v21 = vld [vmem:[%s4338_s24 + $0x38] sm:$0xff] }
 0x1ad   : > { %v1678_v35 = vpack.c.bf16 %v1652_v21, %v1651_v34 }
 0x1ae   : > { %1790 = vmatpush1.bf16.msra.mxu0 %v3456_v39  ;;  %927 = vmatmul.mubr.bf16.gmra.mrb[32].mxu1 %v710_v59  ;;  %v627_v39 = vld [vmem:[%s4320_s22 + $0x80] sm:$0xff]  ;;  %v1286_v59 = vld [vmem:[%s4335_s25 + $0xd0] sm:$0xff] }
 0x1af   : > { %1791 = vmatprep.subr.bf16.mxu0 %v3461_v41  ;;  %936 = vmatprep.mubr.bf16.mxu1 %v3890_v1  ;;  %v1280_v41 = vld [vmem:[%s4335_s25 + $0xa0] sm:$0xff] }
 0x1b1   : > { %1445 = vmatmul.mubr.bf16.gmra.mrb[4].mxu0 %v1291_v42  ;;  %v1281_v42 = vld [vmem:[%s4335_s25 + $0xa8] sm:$0xff] }
 0x1b2   : > { %1454 = vmatprep.mubr.bf16.mxu0 %v3890_v1  ;;  %1792 = vmatpush1.bf16.msra.mxu0 %v3459_v43  ;;  %v649_v43 = vpack.c.bf16 %v628_v40, %v627_v39  ;;  %v1655_v39 = vld [vmem:[%s4338_s24 + $0x50] sm:$0xff]  ;;  %v1656_v40 = vld [vmem:[%s4338_s24 + $0x58] sm:$0xff] }
 0x1b3   : > { %1793 = vmatprep.subr.bf16.mxu0 %v3464_v44  ;;  %v1300_v44 = vpack.c.bf16 %v1281_v42, %v1280_v41  ;;  %v1680_v41 = vpack.c.bf16 %v1656_v40, %v1655_v39  ;;  %v1657_v42 = vld [vmem:[%s4338_s24 + $0x60] sm:$0xff] }
 0x1b6   : > { %1794 = vmatpush1.bf16.msra.mxu0 %v3462_v49  ;;  %937 = vmatmul.mubr.bf16.gmra.mrb[36].mxu1 %v711_v20  ;;  %v650_v49 = vpack.c.bf16 %v630_v46, %v629_v45  ;;  %v1289_v20 = vld [vmem:[%s4335_s25 + $0xe8] sm:$0xff]  ;;  %v1659_v46 = vld [vmem:[%s4338_s24 + $0x70] sm:$0xff] }
 0x1b7   : > { %1795 = vmatprep.subr.bf16.mxu0 %v3467_v51  ;;  %946 = vmatprep.mubr.bf16.mxu1 %v3890_v1  ;;  %v631_v51 = vld [vmem:[%s4320_s22 + $0xa0] sm:$0xff]  ;;  %v1304_v24 = vpack.c.bf16 %v1289_v20, %v1288_v19  ;;  %v1666_v19 = vld [vmem:[%s4338_s24 + $0xa8] sm:$0xff] }
 0x1b9   : > { %1455 = vmatmul.mubr.bf16.gmra.mrb[8].mxu0 %v1292_v52  ;;  %v632_v52 = vld [vmem:[%s4320_s22 + $0xa8] sm:$0xff] }
 0x1ba   : > { %1464 = vmatprep.mubr.bf16.mxu0 %v3890_v1  ;;  %1796 = vmatpush1.bf16.msra.mxu0 %v3465_v53  ;;  %v1284_v53 = vld [vmem:[%s4335_s25 + $0xc0] sm:$0xff]  ;;  %v651_v55 = vpack.c.bf16 %v632_v52, %v631_v51  ;;  %v1682_v51 = vpack.c.bf16 %v1660_v47, %v1659_v46 }
 0x1bb   : > { %1797 = vmatprep.subr.bf16.mxu0 %v3470_v56  ;;  %v1302_v56 = vpack.c.bf16 %v1285_v54, %v1284_v53  ;;  %v1661_v53 = vld [vmem:[%s4338_s24 + $0x80] sm:$0xff]  ;;  %v1662_v54 = vld [vmem:[%s4338_s24 + $0x88] sm:$0xff] }
 0x1be   : > { %1798 = vmatpush1.bf16.msra.mxu0 %v3468_v60  ;;  %947 = vmatmul.mubr.bf16.gmra.mrb[40].mxu1 %v712_v25  ;;  %v1287_v60 = vld [vmem:[%s4335_s25 + $0xd8] sm:$0xff] }
 0x1bf   : > { %1799 = vmatprep.subr.bf16.mxu0 %v3473_v61  ;;  %956 = vmatprep.mubr.bf16.mxu1 %v3890_v1  ;;  %v652_v61 = vpack.c.bf16 %v634_v58, %v633_v57  ;;  %v3482_v25 = vld [vmem:[#allocation14 + $0x10] sm:$0xff]   ;;  %v1683_v58 = vpack.c.bf16 %v1662_v54, %v1661_v53 }
 0x1c1   : > { %1465 = vmatmul.mubr.bf16.gmra.mrb[12].mxu0 %v1293_v62  ;;  %v1303_v62 = vpack.c.bf16 %v1287_v60, %v1286_v59  ;;  %v1663_v60 = vld [vmem:[%s4338_s24 + $0x90] sm:$0xff] }
 0x1c2   : > { %1474 = vmatprep.mubr.bf16.mxu0 %v3890_v1  ;;  %1800 = vmatpush1.bf16.msra.mxu0 %v3471_v63  ;;  %v635_v63 = vld [vmem:[%s4320_s22 + $0xc0] sm:$0xff] }
 0x1c3   : > { %1801 = vmatprep.subr.bf16.mxu0 %v3476_v2  ;;  %v3478_v2 = vld [vmem:[#allocation14] sm:$0xff]  }
 0x1c6   : > { %1802 = vmatpush1.bf16.msra.mxu0 %v3474_v22  ;;  %957 = vmatmul.mubr.bf16.gmra.mrb[44].mxu1 %v713_v9  ;;  %v653_v22 = vpack.c.bf16 %v636_v0, %v635_v63  ;;  %v1675_v9 = vpack.c.bf16 %v1646_v27, %v1645_v26  ;;  %v1686_v27 = vpack.c.bf16 %v1668_v5, %v1667_v4  ;;  %v2032_v4 = vlaneseq }
 0x1c7   : > { %966 = vmatprep.mubr.bf16.mxu1 %v3890_v1 }
 0x1c9   : > { %1475 = vmatmul.mubr.bf16.gmra.mrb[16].mxu0 %v1294_v23  ;;  %v3480_v23 = vld [vmem:[#allocation14 + $0x8] sm:$0xff]  }
 0x1ca   : > { %1484 = vmatprep.mubr.bf16.mxu0 %v3890_v1 }
 0x1ce   : > { %967 = vmatmul.mubr.bf16.gmra.mrb[48].mxu1 %v714_v29  ;;  %v1647_v29 = vld [vmem:[%s4338_s24 + $0x10] sm:$0xff] }
 0x1cf   : > { %976 = vmatprep.mubr.bf16.mxu1 %v3890_v1 }
 0x1d1   : > { %1485 = vmatmul.mubr.bf16.gmra.mrb[20].mxu0 %v1295_v6  ;;  %v3483_v6 = vld [vmem:[#allocation14 + $0x58] sm:$0xff]  }
 0x1d2   : > { %1494 = vmatprep.mubr.bf16.mxu0 %v3890_v1 }
 0x1d6   : > { %977 = vmatmul.mubr.bf16.gmra.mrb[52].mxu1 %v715_v32  ;;  %v1650_v32 = vld [vmem:[%s4338_s24 + $0x28] sm:$0xff] }
 0x1d7   : > { %986 = vmatprep.mubr.bf16.mxu1 %v3890_v1 }
 0x1d9   : > { %1495 = vmatmul.mubr.bf16.gmra.mrb[24].mxu0 %v1296_v28  ;;  %v3485_v28 = vld [vmem:[#allocation14 + $0x60] sm:$0xff]  }
 0x1da   : > { %1504 = vmatprep.mubr.bf16.mxu0 %v3890_v1 }
 0x1de   : > { %987 = vmatmul.mubr.bf16.gmra.mrb[56].mxu1 %v716_v37  ;;  %v1654_v37 = vld [vmem:[%s4338_s24 + $0x48] sm:$0xff] }
 0x1df   : > { %1189 = vmatprep.mubr.bf16.mxu1 %v3890_v1 }
 0x1e1   : > { %1505 = vmatmul.mubr.bf16.gmra.mrb[28].mxu0 %v1297_v14  ;;  %v1648_v14 = vld [vmem:[%s4338_s24 + $0x18] sm:$0xff] }
 0x1e2   : > { %1514 = vmatprep.mubr.bf16.mxu0 %v3890_v1  ;;  %v1676_v17 = vpack.c.bf16 %v1648_v14, %v1647_v29 }
 0x1e6   : > { %1190 = vmatmul.mubr.bf16.vlgmr.msra.gmra.mrb[32].mxu1 %v649_v43  ;;  %v1658_v43 = vld [vmem:[%s4338_s24 + $0x68] sm:$0xff] }
 0x1e7   : > { %1199 = vmatprep.mubr.bf16.mxu1 %v3890_v1  ;;  %2904 = vmatpush3.bf16.msra.mxu1 %v3478_v2 }
 0x1e8   : > { %2905 = vmatprep.subr.bf16.mxu1 %v3479_v16  ;;  %v1665_v16 = vld [vmem:[%s4338_s24 + $0xa0] sm:$0xff] }
 0x1e9   : > { %1515 = vmatmul.mubr.bf16.gmra.mrb[32].mxu0 %v1298_v33  ;;  %v1677_v33 = vpack.c.bf16 %v1650_v32, %v1649_v18  ;;  %v1672_v18 = vld [vmem:[%s4338_s24 + $0xd8] sm:$0xff] }
 0x1ea   : > { %1524 = vmatprep.mubr.bf16.mxu0 %v3890_v1 }
 0x1eb   : > { %2906 = vmatpush3.bf16.msra.mxu1 %v3480_v23 }
 0x1ec   : > { %2907 = vmatprep.subr.bf16.mxu1 %v3481_v3 }
 0x1ee   : > { %1200 = vmatmul.mubr.bf16.gmra.mrb[36].mxu1 %v650_v49 }
 0x1ef   : > { %1209 = vmatprep.mubr.bf16.mxu1 %v3890_v1  ;;  %2908 = vmatpush3.bf16.msra.mxu1 %v3482_v25 }
 0x1f0   : > { %2909 = vmatprep.subr.bf16.mxu1 %v3483_v6 }
 0x1f1   : > { %1525 = vmatmul.mubr.bf16.gmra.mrb[36].mxu0 %v1299_v38  ;;  %v1679_v38 = vpack.c.bf16 %v1654_v37, %v1653_v36  ;;  %v1673_v36 = vld [vmem:[%s4338_s24 + $0xe0] sm:$0xff]  ;;  %v1674_v37 = vld [vmem:[%s4338_s24 + $0xe8] sm:$0xff] }
 0x1f2   : > { %1534 = vmatprep.mubr.bf16.mxu0 %v3890_v1 }
 0x1f3   : > { %2910 = vmatpush3.bf16.msra.mxu1 %v3484_v8  ;;  %v3490_v8 = vld [vmem:[#allocation14 + $0x30] sm:$0xff]  }
 0x1f4   : > { %2911 = vmatprep.subr.bf16.mxu1 %v3485_v28  ;;  %v3491_v28 = vld [vmem:[#allocation14 + $0x78] sm:$0xff]  }
 0x1f6   : > { %1210 = vmatmul.mubr.bf16.gmra.mrb[40].mxu1 %v651_v55 }
 0x1f7   : > { %1219 = vmatprep.mubr.bf16.mxu1 %v3890_v1  ;;  %2912 = vmatpush3.bf16.msra.mxu1 %v3486_v12 }
 0x1f8   : > { %2913 = vmatprep.subr.bf16.mxu1 %v3487_v13  ;;  %v3492_v13 = vld [vmem:[#allocation14 + $0x38] sm:$0xff]  }
 0x1f9   : > { %1535 = vmatmul.mubr.bf16.gmra.mrb[40].mxu0 %v1300_v44  ;;  %v1681_v44 = vpack.c.bf16 %v1658_v43, %v1657_v42 }
 0x1fa   : > { %1544 = vmatprep.mubr.bf16.mxu0 %v3890_v1 }
 0x1fb   : > { %2914 = vmatpush3.bf16.msra.mxu1 %v3488_v31 }
 0x1fe   : > { %1220 = vmatmul.mubr.bf16.gmra.mrb[44].mxu1 %v652_v61  ;;  %v1664_v61 = vld [vmem:[%s4338_s24 + $0x98] sm:$0xff] }
 0x1ff   : > { %1229 = vmatprep.mubr.bf16.mxu1 %v3890_v1  ;;  %v1684_v15 = vpack.c.bf16 %v1664_v61, %v1663_v60 }
 0x201   : > { %1545 = vmatmul.mubr.bf16.gmra.mrb[44].mxu0 %v1301_v50 }
 0x202   : > { %1554 = vmatprep.mubr.bf16.mxu0 %v3890_v1 }
 0x206   : > { %1230 = vmatmul.mubr.bf16.gmra.mrb[48].mxu1 %v653_v22 }
 0x207   : > { %1239 = vmatprep.mubr.bf16.mxu1 %v3890_v1 }
 0x209   : > { %1555 = vmatmul.mubr.bf16.gmra.mrb[48].mxu0 %v1302_v56 }
 0x20a   : > { %1564 = vmatprep.mubr.bf16.mxu0 %v3890_v1 }
 0x20e   : > { %1240 = vmatmul.mubr.bf16.gmra.mrb[52].mxu1 %v654_v7  ;;  %v3489_v7 = vld [vmem:[#allocation14 + $0x70] sm:$0xff]  }
 0x20f   : > { %1249 = vmatprep.mubr.bf16.mxu1 %v3890_v1  ;;  %2915 = vmatprep.subr.bf16.mxu1 %v3489_v7 }
 0x210   : > { %2916 = vmatpush3.bf16.msra.mxu1 %v3490_v8 }
 0x211   : > { %1565 = vmatmul.mubr.bf16.gmra.mrb[52].mxu0 %v1303_v62  ;;  %2917 = vmatprep.subr.bf16.mxu1 %v3491_v28  ;;  %v2033_v28 = vshrl.u32 %v2032_v4, 7 }
 0x212   : > { %1574 = vmatprep.mubr.bf16.mxu0 %v3890_v1 }
 0x214   : > { %2918 = vmatpush3.bf16.msra.mxu1 %v3492_v13  ;;  %v2030_v13 = vld [vmem:[#allocation12] sm:$0x3] }
 0x216   : > { %1250 = vmatmul.mubr.bf16.gmra.mrb[56].mxu1 %v655_v30  ;;  %v1687_v30 = vpack.c.bf16 %v1670_v11, %v1669_v10  ;;  %v2034_v10 = vsub.s32 0, %v2033_v28 }
 0x219   : > { %1575 = vmatmul.mubr.bf16.gmra.mrb[56].mxu0 %v1304_v24  ;;  %v1685_v24 = vpack.c.bf16 %v1666_v19, %v1665_v16 }
 0x21a   : > { %1819 = vmatprep.mubr.bf16.mxu0 %v3890_v1 }
 0x221   : > { %1820 = vmatmul.mubr.bf16.vlgmr.msra.gmra.mrb[0].mxu0 %v1675_v9 }
 0x222   : > { %1829 = vmatprep.mubr.bf16.mxu0 %v3890_v1 }
 0x229   : > { %1830 = vmatmul.mubr.bf16.gmra.mrb[4].mxu0 %v1676_v17  ;;  %v1671_v17 = vld [vmem:[%s4338_s24 + $0xd0] sm:$0xff] }
 0x22a   : > { %1839 = vmatprep.mubr.bf16.mxu0 %v3890_v1  ;;  %v1688_v21 = vpack.c.bf16 %v1672_v18, %v1671_v17 }
 0x231   : > { %1840 = vmatmul.mubr.bf16.gmra.mrb[8].mxu0 %v1677_v33 }
 0x232   : > { %1849 = vmatprep.mubr.bf16.mxu0 %v3890_v1 }
 0x239   : > { %1850 = vmatmul.mubr.bf16.gmra.mrb[12].mxu0 %v1678_v35 }
 0x23a   : > { %1859 = vmatprep.mubr.bf16.mxu0 %v3890_v1 }
 0x241   : > { %1860 = vmatmul.mubr.bf16.gmra.mrb[16].mxu0 %v1679_v38  ;;  %v4577_v45 = vpop.f32.mrb[0].mxu1 }
 0x242   : > { %1869 = vmatprep.mubr.bf16.mxu0 %v3890_v1  ;;  %v4582_v48 = vpop.f32.mrb[1].mxu1 }
 0x243   : > { %v4584_v49 = vpop.f32.mrb[2].mxu1 }
 0x244   : > { %v4586_v50 = vpop.f32.mrb[3].mxu1 }
 0x249   : > { %1870 = vmatmul.mubr.bf16.gmra.mrb[20].mxu0 %v1680_v41  ;;  %v4588_v52 = vpop.f32.mrb[4].mxu1  ;;  %v1689_v41 = vpack.c.bf16 %v1674_v37, %v1673_v36 }
 0x24a   : > { %1879 = vmatprep.mubr.bf16.mxu0 %v3890_v1  ;;  %v4593_v55 = vpop.f32.mrb[5].mxu1 }
 0x24b   : > { %v4595_v56 = vpop.f32.mrb[6].mxu1 }
 0x24c   : > { %v4597_v57 = vpop.f32.mrb[7].mxu1 }
 0x251   : > { %1880 = vmatmul.mubr.bf16.gmra.mrb[24].mxu0 %v1681_v44  ;;  %v4599_v59 = vpop.f32.mrb[8].mxu1 }
 0x252   : > { %1889 = vmatprep.mubr.bf16.mxu0 %v3890_v1  ;;  %v4604_v62 = vpop.f32.mrb[9].mxu1 }
 0x253   : > { %v4606_v63 = vpop.f32.mrb[10].mxu1 }
 0x254   : > { %v4608_v0 = vpop.f32.mrb[11].mxu1 }
 0x259   : > { %1890 = vmatmul.mubr.bf16.gmra.mrb[28].mxu0 %v1682_v51  ;;  %v4610_v2 = vpop.f32.mrb[12].mxu1 }
 0x25a   : > { %1899 = vmatprep.mubr.bf16.mxu0 %v3890_v1  ;;  %v4615_v20 = vpop.f32.mrb[13].mxu1 }
 0x25b   : > { %v4617_v22 = vpop.f32.mrb[14].mxu1 }
 0x25c   : > { %v4619_v23 = vpop.f32.mrb[15].mxu1 }
 0x261   : > { %1900 = vmatmul.mubr.bf16.gmra.mrb[32].mxu0 %v1683_v58  ;;  %v4621_v3 = vpop.f32.mrb[16].mxu1 }
 0x262   : > { %1909 = vmatprep.mubr.bf16.mxu0 %v3890_v1  ;;  %v4626_v25 = vpop.f32.mrb[17].mxu1 }
 0x263   : > { %v4628_v6 = vpop.f32.mrb[18].mxu1 }
 0x264   : > { %v4630_v26 = vpop.f32.mrb[19].mxu1 }
 0x269   : > { %1910 = vmatmul.mubr.bf16.gmra.mrb[36].mxu0 %v1684_v15  ;;  %v4632_v9 = vpop.f32.mrb[20].mxu1 }
 0x26a   : > { %1919 = vmatprep.mubr.bf16.mxu0 %v3890_v1  ;;  %v4637_v12 = vpop.f32.mrb[21].mxu1 }
 0x26b   : > { %v4639_v29 = vpop.f32.mrb[22].mxu1 }
 0x26c   : > { %v4641_v14 = vpop.f32.mrb[23].mxu1 }
 0x271   : > { %1920 = vmatmul.mubr.bf16.gmra.mrb[40].mxu0 %v1685_v24  ;;  %v4643_v31 = vpop.f32.mrb[24].mxu1 }
 0x272   : > { %1929 = vmatprep.mubr.bf16.mxu0 %v3890_v1  ;;  %v4648_v32 = vpop.f32.mrb[25].mxu1 }
 0x273   : > { %v4650_v33 = vpop.f32.mrb[26].mxu1 }
 0x274   : > { %v4652_v34 = vpop.f32.mrb[27].mxu1 }
 0x279   : > { %1930 = vmatmul.mubr.bf16.gmra.mrb[44].mxu0 %v1686_v27  ;;  %v4654_v35 = vpop.f32.mrb[28].mxu1 }
 0x27a   : > { %1939 = vmatprep.mubr.bf16.mxu0 %v3890_v1  ;;  %v4659_v38 = vpop.f32.mrb[29].mxu1 }
 0x27b   : > { %v4661_v39 = vpop.f32.mrb[30].mxu1 }
 0x27c   : > { %v4663_v40 = vpop.f32.mrb[31].mxu1 }
 0x281   : > { %1940 = vmatmul.mubr.bf16.gmra.mrb[48].mxu0 %v1687_v30  ;;  %v2038_v30 = vsub.s32 1, %v2033_v28 }
 0x282   : > { %1949 = vmatprep.mubr.bf16.mxu0 %v3890_v1 }
 0x283   : > { %v4717_v4 = vrot.slane %v2030_v13, %v2038_v30 }
 0x289   : > { %1950 = vmatmul.mubr.bf16.gmra.mrb[52].mxu0 %v1688_v21 }
 0x28a   : > { %1959 = vmatprep.mubr.bf16.mxu0 %v3890_v1 }
 0x291   : > { %1960 = vmatmul.mubr.bf16.gmra.mrb[56].mxu0 %v1689_v41  ;;  %v4714_v41 = vrot.slane %v2030_v13, %v2034_v10 }
 0x2b9   : > { %v4665_v42 = vpop.f32.mrb[32].mxu1 }
 0x2ba   : > { %v4667_v43 = vpop.f32.mrb[33].mxu1 }
 0x2bb   : > { %v4669_v44 = vpop.f32.mrb[34].mxu1 }
 0x2bc   : > { %v4671_v46 = vpop.f32.mrb[35].mxu1 }
 0x2c1   : > { %v4673_v47 = vpop.f32.mrb[36].mxu1 }
 0x2c2   : > { %v4675_v1 = vpop.f32.mrb[37].mxu1 }
 0x2c3   : > { %v4677_v51 = vpop.f32.mrb[38].mxu1 }
 0x2c4   : > { %v4679_v53 = vpop.f32.mrb[39].mxu1 }
 0x2c9   : > { %v4681_v54 = vpop.f32.mrb[40].mxu1 }
 0x2ca   : > { %v4683_v58 = vpop.f32.mrb[41].mxu1 }
 0x2cb   : > { %v4685_v60 = vpop.f32.mrb[42].mxu1 }
 0x2cc   : > { %v4687_v61 = vpop.f32.mrb[43].mxu1 }
 0x2d1   : > { %v4689_v15 = vpop.f32.mrb[44].mxu1 }
 0x2d2   : > { %v4691_v16 = vpop.f32.mrb[45].mxu1 }
 0x2d3   : > { %v4693_v19 = vpop.f32.mrb[46].mxu1 }
 0x2d4   : > { %v4695_v24 = vpop.f32.mrb[47].mxu1 }
 0x2d9   : > { %v4697_v5 = vpop.f32.mrb[48].mxu1 }
 0x2da   : > { %5099 = vst [vmem:[#allocation38_spill] sm:$0xff] %v4697_v5  ;;  %v4699_v27 = vpop.f32.mrb[49].mxu1 }
 0x2db   : > { %5100 = vst [vmem:[#allocation39_spill] sm:$0xff] %v4699_v27  ;;  %v4701_v7 = vpop.f32.mrb[50].mxu1 }
 0x2dc   : > { %5101 = vst [vmem:[#allocation40_spill] sm:$0xff] %v4701_v7  ;;  %v4703_v8 = vpop.f32.mrb[51].mxu1 }
 0x2dd   : > { %5102 = vst [vmem:[#allocation41_spill] sm:$0xff] %v4703_v8 }
 0x2e1   : > { %v4705_v11 = vpop.f32.mrb[52].mxu1 }
 0x2e2   : > { %5103 = vst [vmem:[#allocation42_spill] sm:$0xff] %v4705_v11  ;;  %v4707_v17 = vpop.f32.mrb[53].mxu1 }
 0x2e3   : > { %5104 = vst [vmem:[#allocation43_spill] sm:$0xff] %v4707_v17  ;;  %v4709_v18 = vpop.f32.mrb[54].mxu1 }
 0x2e4   : > { %5105 = vst [vmem:[#allocation44_spill] sm:$0xff] %v4709_v18  ;;  %v4711_v36 = vpop.f32.mrb[55].mxu1 }
 0x2e5   : > { %5106 = vst [vmem:[#allocation45_spill] sm:$0xff] %v4711_v36 }
 0x2e9   : > { %v4723_v36 = vpop.f32.mrb[56].mxu1 }
 0x2f4   : > { %v1821_v21 = vpop.f32.mrb[0].mxu0 }
 0x2f5   : > { %v3070_v37 = vadd.f32 %v1821_v21, %v4577_v45  ;;  %v1823_v7 = vpop.f32.mrb[1].mxu0  ;;  %v4727_v21 = vpop.f32.mrb[57].mxu1 }
 0x2f6   : > { %v3071_v8 = vadd.f32 %v1823_v7, %v4582_v48  ;;  %v1825_v27 = vpop.f32.mrb[2].mxu0  ;;  %v4729_v7 = vpop.f32.mrb[58].mxu1 }
 0x2f7   : > { %v3072_v11 = vadd.f32 %v1825_v27, %v4584_v49  ;;  %v1827_v28 = vpop.f32.mrb[3].mxu0  ;;  %v2042_v18 = vadd.f32 %v3070_v37, %v4714_v41  ;;  %v4731_v27 = vpop.f32.mrb[59].mxu1 }
 0x2f8   : > { %v3073_v17 = vadd.f32 %v1827_v28, %v4586_v50  ;;  %v2043_v45 = vadd.f32 %v3071_v8, %v4717_v4  ;;  %5107 = vst [vmem:[#allocation46_spill] sm:$0xff] %v4731_v27 }
 0x2f9   : > { %v2044_v5 = vadd.f32 %v3072_v11, %v4714_v41 }
 0x2fa   : > { %v2045_v10 = vadd.f32 %v3073_v17, %v4717_v4 }
 0x2fb   : > { %v2102_v48 = vpack.c.bf16 %v2044_v5, %v2042_v18 }
 0x2fc   : > { %v1831_v13 = vpop.f32.mrb[4].mxu0  ;;  %v2103_v49 = vpack.c.bf16 %v2045_v10, %v2043_v45 }
 0x2fd   : > { %v3074_v50 = vadd.f32 %v1831_v13, %v4588_v52  ;;  %v1833_v30 = vpop.f32.mrb[5].mxu0 }
 0x2fe   : > { %v3075_v11 = vadd.f32 %v1833_v30, %v4593_v55  ;;  %v1835_v37 = vpop.f32.mrb[6].mxu0  ;;  %2299 = vmatprep.mubr.bf16.mxu1 %v2103_v49 }
 0x2ff   : > { %v3076_v8 = vadd.f32 %v1835_v37, %v4595_v56  ;;  %v1837_v28 = vpop.f32.mrb[7].mxu0  ;;  %2300 = vmatmul.mubr.bf16.vlgmr.msra.gmra.mrb[60].mxu1 %v2102_v48  ;;  %v2046_v5 = vadd.f32 %v3074_v50, %v4714_v41 }
 0x300   : > { %v3077_v17 = vadd.f32 %v1837_v28, %v4597_v57  ;;  %v2047_v45 = vadd.f32 %v3075_v11, %v4717_v4 }
 0x301   : > { %v2048_v18 = vadd.f32 %v3076_v8, %v4714_v41 }
 0x302   : > { %v2049_v10 = vadd.f32 %v3077_v17, %v4717_v4 }
 0x303   : > { %v2104_v52 = vpack.c.bf16 %v2048_v18, %v2046_v5 }
 0x304   : > { %v1841_v13 = vpop.f32.mrb[8].mxu0  ;;  %v2105_v27 = vpack.c.bf16 %v2049_v10, %v2047_v45 }
 0x305   : > { %v3078_v55 = vadd.f32 %v1841_v13, %v4599_v59  ;;  %v1843_v49 = vpop.f32.mrb[9].mxu0 }
 0x306   : > { %v3079_v56 = vadd.f32 %v1843_v49, %v4604_v62  ;;  %v1845_v30 = vpop.f32.mrb[10].mxu0  ;;  %2307 = vmatprep.mubr.bf16.mxu1 %v2105_v27 }
 0x307   : > { %v3080_v57 = vadd.f32 %v1845_v30, %v4606_v63  ;;  %v1847_v48 = vpop.f32.mrb[11].mxu0  ;;  %2308 = vmatmul.mubr.bf16.gmra.mrb[64].mxu1 %v2104_v52  ;;  %v2050_v11 = vadd.f32 %v3078_v55, %v4714_v41 }
 0x308   : > { %v3081_v50 = vadd.f32 %v1847_v48, %v4608_v0  ;;  %v2051_v8 = vadd.f32 %v3079_v56, %v4717_v4 }
 0x309   : > { %v2052_v37 = vadd.f32 %v3080_v57, %v4714_v41 }
 0x30a   : > { %v2053_v28 = vadd.f32 %v3081_v50, %v4717_v4 }
 0x30b   : > { %v2106_v59 = vpack.c.bf16 %v2052_v37, %v2050_v11 }
 0x30c   : > { %v1851_v17 = vpop.f32.mrb[12].mxu0  ;;  %v2107_v5 = vpack.c.bf16 %v2053_v28, %v2051_v8 }
 0x30d   : > { %v3082_v62 = vadd.f32 %v1851_v17, %v4610_v2  ;;  %v1853_v27 = vpop.f32.mrb[13].mxu0 }
 0x30e   : > { %v3083_v63 = vadd.f32 %v1853_v27, %v4615_v20  ;;  %v1855_v18 = vpop.f32.mrb[14].mxu0  ;;  %2315 = vmatprep.mubr.bf16.mxu1 %v2107_v5 }
 0x30f   : > { %v3084_v0 = vadd.f32 %v1855_v18, %v4617_v22  ;;  %v1857_v45 = vpop.f32.mrb[15].mxu0  ;;  %2316 = vmatmul.mubr.bf16.gmra.mrb[68].mxu1 %v2106_v59  ;;  %v2054_v52 = vadd.f32 %v3082_v62, %v4714_v41 }
 0x310   : > { %v3085_v10 = vadd.f32 %v1857_v45, %v4619_v23  ;;  %v2055_v55 = vadd.f32 %v3083_v63, %v4717_v4 }
 0x311   : > { %v2056_v13 = vadd.f32 %v3084_v0, %v4714_v41 }
 0x312   : > { %v2057_v49 = vadd.f32 %v3085_v10, %v4717_v4 }
 0x313   : > { %v2108_v2 = vpack.c.bf16 %v2056_v13, %v2054_v52 }
 0x314   : > { %v1861_v56 = vpop.f32.mrb[16].mxu0  ;;  %v2109_v30 = vpack.c.bf16 %v2057_v49, %v2055_v55 }
 0x315   : > { %v3086_v20 = vadd.f32 %v1861_v56, %v4621_v3  ;;  %v1863_v57 = vpop.f32.mrb[17].mxu0 }
 0x316   : > { %v3087_v22 = vadd.f32 %v1863_v57, %v4626_v25  ;;  %v1865_v48 = vpop.f32.mrb[18].mxu0  ;;  %2323 = vmatprep.mubr.bf16.mxu1 %v2109_v30 }
 0x317   : > { %v3088_v23 = vadd.f32 %v1865_v48, %v4628_v6  ;;  %v1867_v50 = vpop.f32.mrb[19].mxu0  ;;  %2324 = vmatmul.mubr.bf16.gmra.mrb[72].mxu1 %v2108_v2  ;;  %v2058_v37 = vadd.f32 %v3086_v20, %v4714_v41 }
 0x318   : > { %v3089_v11 = vadd.f32 %v1867_v50, %v4630_v26  ;;  %v2059_v28 = vadd.f32 %v3087_v22, %v4717_v4 }
 0x319   : > { %v2060_v8 = vadd.f32 %v3088_v23, %v4714_v41 }
 0x31a   : > { %v2061_v59 = vadd.f32 %v3089_v11, %v4717_v4 }
 0x31b   : > { %v2110_v3 = vpack.c.bf16 %v2060_v8, %v2058_v37 }
 0x31c   : > { %v1871_v17 = vpop.f32.mrb[20].mxu0  ;;  %v2111_v5 = vpack.c.bf16 %v2061_v59, %v2059_v28 }
 0x31d   : > { %v3090_v25 = vadd.f32 %v1871_v17, %v4632_v9  ;;  %v1873_v62 = vpop.f32.mrb[21].mxu0 }
 0x31e   : > { %v3091_v6 = vadd.f32 %v1873_v62, %v4637_v12  ;;  %v1875_v27 = vpop.f32.mrb[22].mxu0  ;;  %2331 = vmatprep.mubr.bf16.mxu1 %v2111_v5 }
 0x31f   : > { %v3092_v26 = vadd.f32 %v1875_v27, %v4639_v29  ;;  %v1877_v63 = vpop.f32.mrb[23].mxu0  ;;  %2332 = vmatmul.mubr.bf16.gmra.mrb[76].mxu1 %v2110_v3  ;;  %v2062_v0 = vadd.f32 %v3090_v25, %v4714_v41 }
 0x320   : > { %v3093_v18 = vadd.f32 %v1877_v63, %v4641_v14  ;;  %v2063_v10 = vadd.f32 %v3091_v6, %v4717_v4 }
 0x321   : > { %v2064_v45 = vadd.f32 %v3092_v26, %v4714_v41 }
 0x322   : > { %v2065_v52 = vadd.f32 %v3093_v18, %v4717_v4 }
 0x323   : > { %v2112_v9 = vpack.c.bf16 %v2064_v45, %v2062_v0 }
 0x324   : > { %v1881_v13 = vpop.f32.mrb[24].mxu0  ;;  %v2113_v55 = vpack.c.bf16 %v2065_v52, %v2063_v10 }
 0x325   : > { %v3094_v12 = vadd.f32 %v1881_v13, %v4643_v31  ;;  %v1883_v49 = vpop.f32.mrb[25].mxu0 }
 0x326   : > { %v3095_v29 = vadd.f32 %v1883_v49, %v4648_v32  ;;  %v1885_v2 = vpop.f32.mrb[26].mxu0  ;;  %2339 = vmatprep.mubr.bf16.mxu1 %v2113_v55 }
 0x327   : > { %v3096_v14 = vadd.f32 %v1885_v2, %v4650_v33  ;;  %v1887_v56 = vpop.f32.mrb[27].mxu0  ;;  %2340 = vmatmul.mubr.bf16.gmra.mrb[80].mxu1 %v2112_v9  ;;  %v2066_v20 = vadd.f32 %v3094_v12, %v4714_v41 }
 0x328   : > { %v3097_v30 = vadd.f32 %v1887_v56, %v4652_v34  ;;  %v2067_v22 = vadd.f32 %v3095_v29, %v4717_v4 }
 0x329   : > { %v2068_v57 = vadd.f32 %v3096_v14, %v4714_v41 }
 0x32a   : > { %v2069_v48 = vadd.f32 %v3097_v30, %v4717_v4 }
 0x32b   : > { %v2114_v31 = vpack.c.bf16 %v2068_v57, %v2066_v20 }
 0x32c   : > { %v1891_v23 = vpop.f32.mrb[28].mxu0  ;;  %v2115_v50 = vpack.c.bf16 %v2069_v48, %v2067_v22 }
 0x32d   : > { %v3098_v32 = vadd.f32 %v1891_v23, %v4654_v35  ;;  %v1893_v11 = vpop.f32.mrb[29].mxu0 }
 0x32e   : > { %v3099_v33 = vadd.f32 %v1893_v11, %v4659_v38  ;;  %v1895_v37 = vpop.f32.mrb[30].mxu0  ;;  %2347 = vmatprep.mubr.bf16.mxu1 %v2115_v50 }
 0x32f   : > { %v3100_v34 = vadd.f32 %v1895_v37, %v4661_v39  ;;  %v1897_v8 = vpop.f32.mrb[31].mxu0  ;;  %2348 = vmatmul.mubr.bf16.gmra.mrb[84].mxu1 %v2114_v31  ;;  %v2070_v59 = vadd.f32 %v3098_v32, %v4714_v41 }
 0x330   : > { %v3101_v28 = vadd.f32 %v1897_v8, %v4663_v40  ;;  %v2071_v17 = vadd.f32 %v3099_v33, %v4717_v4 }
 0x331   : > { %v2072_v3 = vadd.f32 %v3100_v34, %v4714_v41 }
 0x332   : > { %v2073_v5 = vadd.f32 %v3101_v28, %v4717_v4 }
 0x333   : > { %v2116_v35 = vpack.c.bf16 %v2072_v3, %v2070_v59 }
 0x334   : > { %v1901_v25 = vpop.f32.mrb[32].mxu0  ;;  %v2117_v62 = vpack.c.bf16 %v2073_v5, %v2071_v17 }
 0x335   : > { %v3102_v38 = vadd.f32 %v1901_v25, %v4665_v42  ;;  %v1903_v6 = vpop.f32.mrb[33].mxu0 }
 0x336   : > { %v3103_v39 = vadd.f32 %v1903_v6, %v4667_v43  ;;  %v1905_v27 = vpop.f32.mrb[34].mxu0  ;;  %2355 = vmatprep.mubr.bf16.mxu1 %v2117_v62 }
 0x337   : > { %v3104_v40 = vadd.f32 %v1905_v27, %v4669_v44  ;;  %v1907_v26 = vpop.f32.mrb[35].mxu0  ;;  %2356 = vmatmul.mubr.bf16.gmra.mrb[88].mxu1 %v2116_v35  ;;  %v2074_v18 = vadd.f32 %v3102_v38, %v4714_v41 }
 0x338   : > { %v3105_v63 = vadd.f32 %v1907_v26, %v4671_v46  ;;  %v2075_v45 = vadd.f32 %v3103_v39, %v4717_v4  ;;  %v5109_v39 = vld [vmem:[#allocation39_spill] sm:$0xff] }
 0x339   : > { %v2076_v0 = vadd.f32 %v3104_v40, %v4714_v41  ;;  %v5110_v40 = vld [vmem:[#allocation40_spill] sm:$0xff] }
 0x33a   : > { %v2077_v10 = vadd.f32 %v3105_v63, %v4717_v4  ;;  %v5111_v63 = vld [vmem:[#allocation41_spill] sm:$0xff] }
 0x33b   : > { %v2118_v42 = vpack.c.bf16 %v2076_v0, %v2074_v18 }
 0x33c   : > { %v1911_v52 = vpop.f32.mrb[36].mxu0  ;;  %v2119_v9 = vpack.c.bf16 %v2077_v10, %v2075_v45 }
 0x33d   : > { %v3106_v43 = vadd.f32 %v1911_v52, %v4673_v47  ;;  %v1913_v13 = vpop.f32.mrb[37].mxu0 }
 0x33e   : > { %v3107_v44 = vadd.f32 %v1913_v13, %v4675_v1  ;;  %v1915_v55 = vpop.f32.mrb[38].mxu0  ;;  %2363 = vmatprep.mubr.bf16.mxu1 %v2119_v9  ;;  %v3891_v9 = vmov 0.0|0.0  }
 0x33f   : > { %v3108_v46 = vadd.f32 %v1915_v55, %v4677_v51  ;;  %v1917_v12 = vpop.f32.mrb[39].mxu0  ;;  %2364 = vmatmul.mubr.bf16.gmra.mrb[92].mxu1 %v2118_v42  ;;  %v2078_v29 = vadd.f32 %v3106_v43, %v4714_v41  ;;  %3009 = vmatprep.subr.bf16.mxu1 %v3891_v9 }
 0x340   : > { %v3109_v49 = vadd.f32 %v1917_v12, %v4679_v53  ;;  %v2079_v14 = vadd.f32 %v3107_v44, %v4717_v4  ;;  %v5112_v44 = vld [vmem:[#allocation42_spill] sm:$0xff]  ;;  %v5113_v12 = vld [vmem:[#allocation43_spill] sm:$0xff] }
 0x341   : > { %v2080_v2 = vadd.f32 %v3108_v46, %v4714_v41 }
 0x342   : > { %v2081_v56 = vadd.f32 %v3109_v49, %v4717_v4 }
 0x343   : > { %v2120_v47 = vpack.c.bf16 %v2080_v2, %v2078_v29  ;;  %v5114_v2 = vld [vmem:[#allocation44_spill] sm:$0xff] }
 0x344   : > { %v1921_v30 = vpop.f32.mrb[40].mxu0  ;;  %v2121_v20 = vpack.c.bf16 %v2081_v56, %v2079_v14 }
 0x345   : > { %v3110_v1 = vadd.f32 %v1921_v30, %v4681_v54  ;;  %v1923_v57 = vpop.f32.mrb[41].mxu0 }
 0x346   : > { %v3111_v51 = vadd.f32 %v1923_v57, %v4683_v58  ;;  %v1925_v22 = vpop.f32.mrb[42].mxu0  ;;  %2371 = vmatprep.mubr.bf16.mxu1 %v2121_v20 }
 0x347   : > { %v3112_v53 = vadd.f32 %v1925_v22, %v4685_v60  ;;  %v1927_v48 = vpop.f32.mrb[43].mxu0  ;;  %2372 = vmatmul.mubr.bf16.gmra.mrb[96].mxu1 %v2120_v47  ;;  %v2082_v23 = vadd.f32 %v3110_v1, %v4714_v41  ;;  %v5115_v47 = vld [vmem:[#allocation45_spill] sm:$0xff] }
 0x348   : > { %v3113_v31 = vadd.f32 %v1927_v48, %v4687_v61  ;;  %v2083_v32 = vadd.f32 %v3111_v51, %v4717_v4 }
 0x349   : > { %v2084_v50 = vadd.f32 %v3112_v53, %v4714_v41 }
 0x34a   : > { %v2085_v11 = vadd.f32 %v3113_v31, %v4717_v4 }
 0x34b   : > { %v2122_v54 = vpack.c.bf16 %v2084_v50, %v2082_v23 }
 0x34c   : > { %v1931_v33 = vpop.f32.mrb[44].mxu0  ;;  %v2123_v37 = vpack.c.bf16 %v2085_v11, %v2083_v32 }
 0x34d   : > { %v3114_v58 = vadd.f32 %v1931_v33, %v4689_v15  ;;  %v1933_v34 = vpop.f32.mrb[45].mxu0  ;;  %v5116_v33 = vld [vmem:[#allocation46_spill] sm:$0xff] }
 0x34e   : > { %v3115_v60 = vadd.f32 %v1933_v34, %v4691_v16  ;;  %v1935_v8 = vpop.f32.mrb[46].mxu0  ;;  %2379 = vmatprep.mubr.bf16.mxu1 %v2123_v37  ;;  %v5108_v16 = vld [vmem:[#allocation38_spill] sm:$0xff] }
 0x34f   : > { %v3116_v61 = vadd.f32 %v1935_v8, %v4693_v19  ;;  %v1937_v28 = vpop.f32.mrb[47].mxu0  ;;  %2380 = vmatmul.mubr.bf16.gmra.mrb[100].mxu1 %v2122_v54  ;;  %v2086_v3 = vadd.f32 %v3114_v58, %v4714_v41 }
 0x350   : > { %v3117_v59 = vadd.f32 %v1937_v28, %v4695_v24  ;;  %v2087_v5 = vadd.f32 %v3115_v60, %v4717_v4 }
 0x351   : > { %v2088_v17 = vadd.f32 %v3116_v61, %v4714_v41 }
 0x352   : > { %v2089_v35 = vadd.f32 %v3117_v59, %v4717_v4  ;;  %v4846_v59 = vld [vmem:[#allocation15] ss:$0 sm:$0xff] }
 0x353   : > { %v2124_v15 = vpack.c.bf16 %v2088_v17, %v2086_v3 }
 0x354   : > { %v1941_v25 = vpop.f32.mrb[48].mxu0  ;;  %v2125_v62 = vpack.c.bf16 %v2089_v35, %v2087_v5 }
 0x355   : > { %v3118_v38 = vadd.f32 %v1941_v25, %v5108_v16  ;;  %v1943_v6 = vpop.f32.mrb[49].mxu0 }
 0x356   : > { %v3119_v19 = vadd.f32 %v1943_v6, %v5109_v39  ;;  %v1945_v27 = vpop.f32.mrb[50].mxu0  ;;  %2387 = vmatprep.mubr.bf16.mxu1 %v2125_v62 }
 0x357   : > { %v3120_v24 = vadd.f32 %v1945_v27, %v5110_v40  ;;  %v1947_v26 = vpop.f32.mrb[51].mxu0  ;;  %2388 = vmatmul.mubr.bf16.gmra.mrb[104].mxu1 %v2124_v15  ;;  %v2090_v0 = vadd.f32 %v3118_v38, %v4714_v41 }
 0x358   : > { %v3121_v18 = vadd.f32 %v1947_v26, %v5111_v63  ;;  %v2091_v10 = vadd.f32 %v3119_v19, %v4717_v4 }
 0x359   : > { %v2092_v45 = vadd.f32 %v3120_v24, %v4714_v41 }
 0x35a   : > { %v2093_v42 = vadd.f32 %v3121_v18, %v4717_v4 }
 0x35b   : > { %v2126_v52 = vpack.c.bf16 %v2092_v45, %v2090_v0 }
 0x35c   : > { %v1951_v43 = vpop.f32.mrb[52].mxu0  ;;  %v2127_v13 = vpack.c.bf16 %v2093_v42, %v2091_v10 }
 0x35d   : > { %v3122_v55 = vadd.f32 %v1951_v43, %v5112_v44  ;;  %v1953_v46 = vpop.f32.mrb[53].mxu0 }
 0x35e   : > { %v3123_v49 = vadd.f32 %v1953_v46, %v5113_v12  ;;  %v1955_v29 = vpop.f32.mrb[54].mxu0  ;;  %2395 = vmatprep.mubr.bf16.mxu1 %v2127_v13 }
 0x35f   : > { %v3124_v14 = vadd.f32 %v1955_v29, %v5114_v2  ;;  %v1957_v56 = vpop.f32.mrb[55].mxu0  ;;  %2396 = vmatmul.mubr.bf16.gmra.mrb[108].mxu1 %v2126_v52  ;;  %v2094_v20 = vadd.f32 %v3122_v55, %v4714_v41 }
 0x360   : > { %v3125_v30 = vadd.f32 %v1957_v56, %v5115_v47  ;;  %v2095_v57 = vadd.f32 %v3123_v49, %v4717_v4 }
 0x361   : > { %v2096_v1 = vadd.f32 %v3124_v14, %v4714_v41 }
 0x362   : > { %v2097_v51 = vadd.f32 %v3125_v30, %v4717_v4 }
 0x363   : > { %v2128_v22 = vpack.c.bf16 %v2096_v1, %v2094_v20 }
 0x364   : > { %v1961_v53 = vpop.f32.mrb[56].mxu0  ;;  %v2129_v48 = vpack.c.bf16 %v2097_v51, %v2095_v57 }
 0x365   : > { %v3126_v31 = vadd.f32 %v1961_v53, %v4723_v36  ;;  %v1963_v23 = vpop.f32.mrb[57].mxu0 }
 0x366   : > { %v3127_v50 = vadd.f32 %v1963_v23, %v4727_v21  ;;  %v1965_v32 = vpop.f32.mrb[58].mxu0  ;;  %2403 = vmatprep.mubr.bf16.mxu1 %v2129_v48  ;;  %v2451_v21 = vld [vmem:[#allocation17 + $0x8] sm:$0xff] }
 0x367   : > { %v3128_v11 = vadd.f32 %v1965_v32, %v4729_v7  ;;  %v1967_v54 = vpop.f32.mrb[59].mxu0  ;;  %2404 = vmatmul.mubr.bf16.gmra.mrb[112].mxu1 %v2128_v22  ;;  %v2098_v58 = vadd.f32 %v3126_v31, %v4714_v41  ;;  %v2895_v7 = vld [vmem:[#allocation2] ss:$0 sm:$0xff] }
 0x368   : > { %v3129_v37 = vadd.f32 %v1967_v54, %v5116_v33  ;;  %v2099_v60 = vadd.f32 %v3127_v50, %v4717_v4  ;;  %2459 = vperm.xlu0 %3380, %v2895_v7  }
 0x369   : > { %v2100_v34 = vadd.f32 %v3128_v11, %v4714_v41 }
 0x36a   : > { %v2101_v8 = vadd.f32 %v3129_v37, %v4717_v4 }
 0x36b   : > { %v2130_v36 = vpack.c.bf16 %v2100_v34, %v2098_v58 }
 0x36c   : > { %v2131_v61 = vpack.c.bf16 %v2101_v8, %v2099_v60 }
 0x36e   : > { %2411 = vmatprep.mubr.bf16.mxu1 %v2131_v61 }
 0x36f   : > { %2412 = vmatmul.mubr.bf16.gmra.mrb[116].mxu1 %v2130_v36 }
 0x370   : > { %2896 = vmatprep.mubr.msk.f32.mxu1 %vm2462_vm0, %v2451_v21 }
 0x3d2   : > { %v2919_v28 = vpop.f32.mrb[60].mxu1 }
 0x3d3   : > { %v2920_v3 = vpop.f32.mrb[61].mxu1 }
 0x3d4   : > { %v2921_v17 = vadd.f32 %v2920_v3, %v2919_v28  ;;  %v2922_v41 = vpop.f32.mrb[62].mxu1 }
 0x3d5   : > { %v2923_v5 = vpop.f32.mrb[63].mxu1 }
 0x3d6   : > { %v2302_v35 = vadd.f32 %v2921_v17, %v4846_v59  ;;  %v2924_v4 = vadd.f32 %v2923_v5, %v2922_v41 }
 0x3d8   : > { %2420 = vst [vmem:[%s4850_s27] sm:$0xff] %v2302_v35  ;;  %v2305_v15 = vadd.f32 %v2924_v4, %v4846_v59 }
 0x3da   : > { %2421 = vst [vmem:[%s4850_s27 + $0x8] sm:$0xff] %v2305_v15  ;;  %v3010_v25 = vpack.c.bf16 %v2305_v15, %v2302_v35  ;;  %v2925_v62 = vpop.f32.mrb[64].mxu1 }
 0x3db   : > { %v2926_v16 = vpop.f32.mrb[65].mxu1 }
 0x3dc   : > { %v2927_v38 = vadd.f32 %v2926_v16, %v2925_v62  ;;  %v2928_v6 = vpop.f32.mrb[66].mxu1  ;;  %3011 = vmatpush1.bf16.msra.mxu1 %v3010_v25 }
 0x3dd   : > { %v2929_v39 = vpop.f32.mrb[67].mxu1  ;;  %3012 = vmatprep.subr.bf16.mxu1 %v3891_v9 }
 0x3de   : > { %v2310_v19 = vadd.f32 %v2927_v38, %v4846_v59  ;;  %v2930_v27 = vadd.f32 %v2929_v39, %v2928_v6 }
 0x3e0   : > { %2422 = vst [vmem:[%s4850_s27 + $0x10] sm:$0xff] %v2310_v19  ;;  %v2313_v40 = vadd.f32 %v2930_v27, %v4846_v59 }
 0x3e2   : > { %2423 = vst [vmem:[%s4850_s27 + $0x18] sm:$0xff] %v2313_v40  ;;  %v3013_v24 = vpack.c.bf16 %v2313_v40, %v2310_v19  ;;  %v2931_v26 = vpop.f32.mrb[68].mxu1 }
 0x3e3   : > { %v2932_v63 = vpop.f32.mrb[69].mxu1 }
 0x3e4   : > { %v2933_v18 = vadd.f32 %v2932_v63, %v2931_v26  ;;  %v2934_v0 = vpop.f32.mrb[70].mxu1  ;;  %3014 = vmatpush1.bf16.msra.mxu1 %v3013_v24 }
 0x3e5   : > { %v2935_v45 = vpop.f32.mrb[71].mxu1  ;;  %3015 = vmatprep.subr.bf16.mxu1 %v3891_v9 }
 0x3e6   : > { %v2318_v10 = vadd.f32 %v2933_v18, %v4846_v59  ;;  %v2936_v42 = vadd.f32 %v2935_v45, %v2934_v0 }
 0x3e8   : > { %2424 = vst [vmem:[%s4850_s27 + $0x20] sm:$0xff] %v2318_v10  ;;  %v2321_v52 = vadd.f32 %v2936_v42, %v4846_v59 }
 0x3ea   : > { %2425 = vst [vmem:[%s4850_s27 + $0x28] sm:$0xff] %v2321_v52  ;;  %v3016_v43 = vpack.c.bf16 %v2321_v52, %v2318_v10  ;;  %v2937_v13 = vpop.f32.mrb[72].mxu1 }
 0x3eb   : > { %v2938_v44 = vpop.f32.mrb[73].mxu1 }
 0x3ec   : > { %v2939_v55 = vadd.f32 %v2938_v44, %v2937_v13  ;;  %v2940_v46 = vpop.f32.mrb[74].mxu1  ;;  %3017 = vmatpush1.bf16.msra.mxu1 %v3016_v43 }
 0x3ed   : > { %v2941_v12 = vpop.f32.mrb[75].mxu1  ;;  %3018 = vmatprep.subr.bf16.mxu1 %v3891_v9 }
 0x3ee   : > { %v2326_v49 = vadd.f32 %v2939_v55, %v4846_v59  ;;  %v2942_v29 = vadd.f32 %v2941_v12, %v2940_v46 }
 0x3f0   : > { %2426 = vst [vmem:[%s4850_s27 + $0x30] sm:$0xff] %v2326_v49  ;;  %v2329_v2 = vadd.f32 %v2942_v29, %v4846_v59 }
 0x3f2   : > { %2427 = vst [vmem:[%s4850_s27 + $0x38] sm:$0xff] %v2329_v2  ;;  %v3019_v14 = vpack.c.bf16 %v2329_v2, %v2326_v49  ;;  %v2943_v56 = vpop.f32.mrb[76].mxu1 }
 0x3f3   : > { %v2944_v47 = vpop.f32.mrb[77].mxu1 }
 0x3f4   : > { %v2945_v30 = vadd.f32 %v2944_v47, %v2943_v56  ;;  %v2946_v20 = vpop.f32.mrb[78].mxu1  ;;  %3020 = vmatpush1.bf16.msra.mxu1 %v3019_v14 }
 0x3f5   : > { %v2947_v1 = vpop.f32.mrb[79].mxu1  ;;  %3021 = vmatprep.subr.bf16.mxu1 %v3891_v9 }
 0x3f6   : > { %v2334_v57 = vadd.f32 %v2945_v30, %v4846_v59  ;;  %v2948_v51 = vadd.f32 %v2947_v1, %v2946_v20 }
 0x3f8   : > { %2428 = vst [vmem:[%s4850_s27 + $0x40] sm:$0xff] %v2334_v57  ;;  %v2337_v22 = vadd.f32 %v2948_v51, %v4846_v59 }
 0x3fa   : > { %2429 = vst [vmem:[%s4850_s27 + $0x48] sm:$0xff] %v2337_v22  ;;  %v3022_v53 = vpack.c.bf16 %v2337_v22, %v2334_v57  ;;  %v2949_v48 = vpop.f32.mrb[80].mxu1 }
 0x3fb   : > { %v2950_v31 = vpop.f32.mrb[81].mxu1 }
 0x3fc   : > { %v2951_v23 = vadd.f32 %v2950_v31, %v2949_v48  ;;  %v2952_v50 = vpop.f32.mrb[82].mxu1  ;;  %3023 = vmatpush1.bf16.msra.mxu1 %v3022_v53 }
 0x3fd   : > { %v2953_v32 = vpop.f32.mrb[83].mxu1  ;;  %3024 = vmatprep.subr.bf16.mxu1 %v3891_v9 }
 0x3fe   : > { %v2342_v11 = vadd.f32 %v2951_v23, %v4846_v59  ;;  %v2954_v54 = vadd.f32 %v2953_v32, %v2952_v50 }
 0x400   : > { %2430 = vst [vmem:[%s4850_s27 + $0x50] sm:$0xff] %v2342_v11  ;;  %v2345_v33 = vadd.f32 %v2954_v54, %v4846_v59 }
 0x402   : > { %2431 = vst [vmem:[%s4850_s27 + $0x58] sm:$0xff] %v2345_v33  ;;  %v3025_v37 = vpack.c.bf16 %v2345_v33, %v2342_v11  ;;  %v2955_v58 = vpop.f32.mrb[84].mxu1 }
 0x403   : > { %v2956_v34 = vpop.f32.mrb[85].mxu1 }
 0x404   : > { %v2957_v60 = vadd.f32 %v2956_v34, %v2955_v58  ;;  %v2958_v8 = vpop.f32.mrb[86].mxu1  ;;  %3026 = vmatpush1.bf16.msra.mxu1 %v3025_v37 }
 0x405   : > { %v2959_v36 = vpop.f32.mrb[87].mxu1  ;;  %3027 = vmatprep.subr.bf16.mxu1 %v3891_v9 }
 0x406   : > { %v2350_v61 = vadd.f32 %v2957_v60, %v4846_v59  ;;  %v2960_v21 = vadd.f32 %v2959_v36, %v2958_v8 }
 0x408   : > { %2432 = vst [vmem:[%s4850_s27 + $0x60] sm:$0xff] %v2350_v61  ;;  %v2353_v7 = vadd.f32 %v2960_v21, %v4846_v59 }
 0x40a   : > { %2433 = vst [vmem:[%s4850_s27 + $0x68] sm:$0xff] %v2353_v7  ;;  %v3028_v28 = vpack.c.bf16 %v2353_v7, %v2350_v61  ;;  %v2961_v3 = vpop.f32.mrb[88].mxu1 }
 0x40b   : > { %v2962_v17 = vpop.f32.mrb[89].mxu1 }
 0x40c   : > { %v2963_v41 = vadd.f32 %v2962_v17, %v2961_v3  ;;  %v2964_v5 = vpop.f32.mrb[90].mxu1  ;;  %3029 = vmatpush1.bf16.msra.mxu1 %v3028_v28 }
 0x40d   : > { %v2965_v35 = vpop.f32.mrb[91].mxu1  ;;  %3030 = vmatprep.subr.bf16.mxu1 %v3891_v9 }
 0x40e   : > { %v2358_v4 = vadd.f32 %v2963_v41, %v4846_v59  ;;  %v2966_v15 = vadd.f32 %v2965_v35, %v2964_v5 }
 0x410   : > { %2434 = vst [vmem:[%s4850_s27 + $0x70] sm:$0xff] %v2358_v4  ;;  %v2361_v25 = vadd.f32 %v2966_v15, %v4846_v59 }
 0x412   : > { %2435 = vst [vmem:[%s4850_s27 + $0x78] sm:$0xff] %v2361_v25  ;;  %v3031_v62 = vpack.c.bf16 %v2361_v25, %v2358_v4  ;;  %v2967_v16 = vpop.f32.mrb[92].mxu1 }
 0x413   : > { %v2968_v38 = vpop.f32.mrb[93].mxu1 }
 0x414   : > { %v2969_v6 = vadd.f32 %v2968_v38, %v2967_v16  ;;  %v2970_v39 = vpop.f32.mrb[94].mxu1  ;;  %3032 = vmatpush1.bf16.msra.mxu1 %v3031_v62  ;;  %v2450_v38 = vld [vmem:[#allocation17] sm:$0xff] }
 0x415   : > { %v2971_v19 = vpop.f32.mrb[95].mxu1  ;;  %3033 = vmatprep.subr.bf16.mxu1 %v3891_v9 }
 0x416   : > { %v2366_v27 = vadd.f32 %v2969_v6, %v4846_v59  ;;  %v2972_v40 = vadd.f32 %v2971_v19, %v2970_v39 }
 0x418   : > { %2436 = vst [vmem:[%s4850_s27 + $0x80] sm:$0xff] %v2366_v27  ;;  %v2369_v24 = vadd.f32 %v2972_v40, %v4846_v59 }
 0x41a   : > { %2437 = vst [vmem:[%s4850_s27 + $0x88] sm:$0xff] %v2369_v24  ;;  %v3034_v26 = vpack.c.bf16 %v2369_v24, %v2366_v27  ;;  %v2973_v63 = vpop.f32.mrb[96].mxu1 }
 0x41b   : > { %v2974_v18 = vpop.f32.mrb[97].mxu1 }
 0x41c   : > { %v2975_v0 = vadd.f32 %v2974_v18, %v2973_v63  ;;  %v2976_v45 = vpop.f32.mrb[98].mxu1  ;;  %3035 = vmatpush1.bf16.msra.mxu1 %v3034_v26 }
 0x41d   : > { %v2977_v10 = vpop.f32.mrb[99].mxu1  ;;  %3036 = vmatprep.subr.bf16.mxu1 %v3891_v9 }
 0x41e   : > { %v2374_v42 = vadd.f32 %v2975_v0, %v4846_v59  ;;  %v2978_v52 = vadd.f32 %v2977_v10, %v2976_v45 }
 0x420   : > { %2438 = vst [vmem:[%s4850_s27 + $0x90] sm:$0xff] %v2374_v42  ;;  %v2377_v43 = vadd.f32 %v2978_v52, %v4846_v59 }
 0x422   : > { %2439 = vst [vmem:[%s4850_s27 + $0x98] sm:$0xff] %v2377_v43  ;;  %v3037_v13 = vpack.c.bf16 %v2377_v43, %v2374_v42  ;;  %v2979_v44 = vpop.f32.mrb[100].mxu1 }
 0x423   : > { %v2980_v55 = vpop.f32.mrb[101].mxu1 }
 0x424   : > { %v2981_v46 = vadd.f32 %v2980_v55, %v2979_v44  ;;  %v2982_v12 = vpop.f32.mrb[102].mxu1  ;;  %3038 = vmatpush1.bf16.msra.mxu1 %v3037_v13 }
 0x425   : > { %v2983_v49 = vpop.f32.mrb[103].mxu1  ;;  %3039 = vmatprep.subr.bf16.mxu1 %v3891_v9 }
 0x426   : > { %v2382_v29 = vadd.f32 %v2981_v46, %v4846_v59  ;;  %v2984_v2 = vadd.f32 %v2983_v49, %v2982_v12 }
 0x428   : > { %2440 = vst [vmem:[%s4850_s27 + $0xa0] sm:$0xff] %v2382_v29  ;;  %v2385_v14 = vadd.f32 %v2984_v2, %v4846_v59 }
 0x42a   : > { %2441 = vst [vmem:[%s4850_s27 + $0xa8] sm:$0xff] %v2385_v14  ;;  %v3040_v56 = vpack.c.bf16 %v2385_v14, %v2382_v29  ;;  %v2985_v47 = vpop.f32.mrb[104].mxu1 }
 0x42b   : > { %v2986_v30 = vpop.f32.mrb[105].mxu1 }
 0x42c   : > { %v2987_v20 = vadd.f32 %v2986_v30, %v2985_v47  ;;  %v2988_v1 = vpop.f32.mrb[106].mxu1  ;;  %3041 = vmatpush1.bf16.msra.mxu1 %v3040_v56 }
 0x42d   : > { %v2989_v57 = vpop.f32.mrb[107].mxu1  ;;  %3042 = vmatprep.subr.bf16.mxu1 %v3891_v9 }
 0x42e   : > { %v2390_v51 = vadd.f32 %v2987_v20, %v4846_v59  ;;  %v2990_v22 = vadd.f32 %v2989_v57, %v2988_v1 }
 0x430   : > { %2442 = vst [vmem:[%s4850_s27 + $0xb0] sm:$0xff] %v2390_v51  ;;  %v2393_v53 = vadd.f32 %v2990_v22, %v4846_v59 }
 0x432   : > { %2443 = vst [vmem:[%s4850_s27 + $0xb8] sm:$0xff] %v2393_v53  ;;  %v3043_v48 = vpack.c.bf16 %v2393_v53, %v2390_v51  ;;  %v2991_v31 = vpop.f32.mrb[108].mxu1 }
 0x433   : > { %v2992_v23 = vpop.f32.mrb[109].mxu1 }
 0x434   : > { %v2993_v50 = vadd.f32 %v2992_v23, %v2991_v31  ;;  %v2994_v32 = vpop.f32.mrb[110].mxu1  ;;  %3044 = vmatpush1.bf16.msra.mxu1 %v3043_v48 }
 0x435   : > { %v2995_v11 = vpop.f32.mrb[111].mxu1  ;;  %3045 = vmatprep.subr.bf16.mxu1 %v3891_v9 }
 0x436   : > { %v2398_v54 = vadd.f32 %v2993_v50, %v4846_v59  ;;  %v2996_v33 = vadd.f32 %v2995_v11, %v2994_v32 }
 0x438   : > { %2444 = vst [vmem:[%s4850_s27 + $0xc0] sm:$0xff] %v2398_v54  ;;  %v2401_v37 = vadd.f32 %v2996_v33, %v4846_v59 }
 0x43a   : > { %2445 = vst [vmem:[%s4850_s27 + $0xc8] sm:$0xff] %v2401_v37  ;;  %v3046_v58 = vpack.c.bf16 %v2401_v37, %v2398_v54  ;;  %v2997_v34 = vpop.f32.mrb[112].mxu1 }
 0x43b   : > { %v2998_v60 = vpop.f32.mrb[113].mxu1 }
 0x43c   : > { %v2999_v8 = vadd.f32 %v2998_v60, %v2997_v34  ;;  %v3000_v36 = vpop.f32.mrb[114].mxu1  ;;  %3047 = vmatpush1.bf16.msra.mxu1 %v3046_v58 }
 0x43d   : > { %v3001_v61 = vpop.f32.mrb[115].mxu1  ;;  %3048 = vmatprep.subr.bf16.mxu1 %v3891_v9 }
 0x43e   : > { %v2406_v21 = vadd.f32 %v2999_v8, %v4846_v59  ;;  %v3002_v7 = vadd.f32 %v3001_v61, %v3000_v36 }
 0x440   : > { %2446 = vst [vmem:[%s4850_s27 + $0xd0] sm:$0xff] %v2406_v21  ;;  %v2409_v28 = vadd.f32 %v3002_v7, %v4846_v59 }
 0x442   : > { %2447 = vst [vmem:[%s4850_s27 + $0xd8] sm:$0xff] %v2409_v28  ;;  %v3049_v3 = vpack.c.bf16 %v2409_v28, %v2406_v21  ;;  %v3003_v17 = vpop.f32.mrb[116].mxu1 }
 0x443   : > { %v3004_v41 = vpop.f32.mrb[117].mxu1 }
 0x444   : > { %v3005_v5 = vadd.f32 %v3004_v41, %v3003_v17  ;;  %v3006_v35 = vpop.f32.mrb[118].mxu1  ;;  %3050 = vmatpush1.bf16.msra.mxu1 %v3049_v3 }
 0x445   : > { %v3007_v4 = vpop.f32.mrb[119].mxu1  ;;  %3051 = vmatprep.subr.bf16.mxu1 %v3891_v9 }
 0x446   : > { %v2414_v15 = vadd.f32 %v3005_v5, %v4846_v59  ;;  %v3008_v25 = vadd.f32 %v3007_v4, %v3006_v35 }
 0x448   : > { %2448 = vst [vmem:[%s4850_s27 + $0xe0] sm:$0xff] %v2414_v15  ;;  %v2417_v62 = vadd.f32 %v3008_v25, %v4846_v59 }
 0x44a   : > { %2449 = vst [vmem:[%s4850_s27 + $0xe8] sm:$0xff] %v2417_v62  ;;  %v3052_v16 = vpack.c.bf16 %v2417_v62, %v2414_v15 }
 0x44c   : > { %3053 = vmatpush1.bf16.msra.mxu1 %v3052_v16 }
 0x44f   : > { %2531 = vmatmul.mubr.f32.vlgmr.msra.gmra.mrb[120].mxu1 %v2450_v38 }
 0x450   : > { %3770 = shalt.err (!%p3767_p1)
}
 0x451   : > { %s3771_s20 = scalar_lea.hbm %s4930_s11, 3840  ;;  %s3775_s23 = scalar_lea.hbm %s5118_s15, 7680 }
 0x452   : > { %p3772_p7 = scmp.ne.s32.totalorder %s4930_s11, %s3771_s20  ;;  %p3776_p11 = scmp.lt.u32.totalorder %s4930_s11, %s5118_s15 }
 0x453   : > { %p3777_p2 = scmp.lt.u32.totalorder %s3775_s23, %s3771_s20  ;;  %p3779_p3 = scmp.lt.u32.totalorder %s3771_s20, %s4930_s11 }
 0x454   : > { %p3773_p0 = pnand %p3772_p7, %p5119_p5 }
 0x455   : > { %p3778_p6 = por %p3777_p2, %p3776_p11 }
 0x456   : > { %p3774_p9 = pneg %p3773_p0 }
 0x457   : > { %p3780_p10 = por %p3779_p3, %p3778_p6 }
 0x459   : > { %p3781_p12 = pnand %p3780_p10, %p3774_p9 }
 0x45b   : > { %3784 = shalt.err (!%p3781_p12)
}
 0x45c   : > { %s3893_s25 = smov 128   ;;  %s3894_s10 = smov 8   ;;  %v2460_v9 = vpop.permute.xlu0 %2459 }
 0x45d   : > { %3283 = dma.vmem_to_hbm [thread:$0]  (%p5119_p5), %s4932_s14, 3840, %s4930_s11, %s2538_s17, %s3893_s25, %s3893_s25, %s3894_s10  }
 0x45e   : > { %s2813_s24 = sshll.u32 %s4313_s1, 3  ;;  %s2899_s27 = sshll.u32 %s5092_s4, 7 }
 0x45f   : > { %s604_s29 = scalar_lea.vmem [#allocation19], %s2813_s24  ;;  %s5120_s5 = sld [smem:[#allocation52_spill]] }
 0x460   : > { %s2572_s16 = sshll.u32 %s604_s29, 4  ;;  %s2543_s14 = scalar_lea.sflag [#allocation20], %s4313_s1  ;;  %s4965_s16 = int_to_ptr.vmem [resolvable:$true] %s2572_s16 }
 0x461   : > { %s3785_s11 = scalar_lea.vmem %s4965_s16, 128  ;;  %s3895_s4 = smov [#allocation19]  }
 0x462   : > { %p3786_p4 = scmp.ne.s32.totalorder %s4965_s16, %s3785_s11  ;;  %s3789_s17 = sshll.u32 %s3895_s4, 4  ;;  %s3790_s17 = int_to_ptr.vmem [resolvable:$false] %s3789_s17 }
 0x463   : > { %s3791_s12 = scalar_lea.vmem %s3790_s17, 256  ;;  %p3792_p1 = scmp.lt.s32.totalorder %s4965_s16, %s3790_s17 }
 0x464   : > { %p3787_p8 = pnand %p3786_p4, %p5119_p5  ;;  %p3793_p7 = scmp.lt.s32.totalorder %s3791_s12, %s3785_s11 }
 0x465   : > { %s4963_s19 = scalar_lea.hbm %s5120_s5, %s2899_s27 }
 0x466   : > { %p3788_p13 = pneg %p3787_p8  ;;  %p3794_p0 = por %p3793_p7, %p3792_p1 }
 0x468   : > { %p3795_p9 = pnand %p3794_p0, %p3788_p13 }
 0x522   : > { %v2532_v59 = vpop.f32.mrb[120].mxu1 }
 0x523   : > { %v2533_v6 = vadd.f32 %v2532_v59, %v2460_v9  ;;  %v2534_v39 = vpop.f32.mrb[121].mxu1 }
 0x525   : > { %2536 = vst [vmem:[%s604_s29] sm:$0xff] %v2533_v6 }
 0x526   : > { %3798 = shalt.err (!%p3795_p9)
}
 0x527   : > { %s3799_s1 = scalar_lea.hbm %s4963_s19, 128  ;;  %s3803_s22 = scalar_lea.hbm %s5120_s5, 256 }
 0x528   : > { %p3800_p11 = scmp.ne.s32.totalorder %s4963_s19, %s3799_s1  ;;  %p3804_p3 = scmp.lt.u32.totalorder %s4963_s19, %s5120_s5 }
 0x529   : > { %p3805_p10 = scmp.lt.u32.totalorder %s3803_s22, %s3799_s1  ;;  %p3807_p4 = scmp.lt.u32.totalorder %s3799_s1, %s4963_s19 }
 0x52a   : > { %p3801_p2 = pnand %p3800_p11, %p5119_p5 }
 0x52b   : > { %p3806_p12 = por %p3805_p10, %p3804_p3 }
 0x52c   : > { %p3802_p6 = pneg %p3801_p2 }
 0x52d   : > { %p3808_p8 = por %p3807_p4, %p3806_p12 }
 0x52f   : > { %p3809_p13 = pnand %p3808_p8, %p3802_p6 }
 0x531   : > { %3812 = shalt.err (!%p3809_p13)
}
 0x532   : > { %3284 = dma.vmem_to_hbm [thread:$0]  (%p5119_p5), %s4965_s16, 128, %s4963_s19, %s2543_s14  }
 0x533 PF: > { %s5121_s18 = sld [smem:[#allocation29_spill]]  ;;  %s5122_s25 = sld [smem:[#allocation33_spill]] }
 0x534   : > { %p5124_p7 = scmp.ge.s32.totalorder %s3875_s9, 2 }
 0x539   : > { %s2584_s10 = sand.u32 1, %s5121_s18   ;;  %p5123_p1 = scmp.ne.s32.totalorder %s5122_s25, 0 }
 0x53a   : > { %s2585_s24 = scalar_lea.sflag [#allocation5], %s2584_s10 }
 0x53b   : > { %p3317_p0 = pnand %p5124_p7, %p5123_p1 }
 0x53d   : > { %3854 = dma.done.wait (!%p3317_p0), %s2585_s24, 3840  }
 0x53e   : > { %3856 = vsyncadd (!%p3317_p0), %s2585_s24, 4294963456  ;;  %s2594_s27 = scalar_lea.sflag [#allocation20], %s2584_s10 }
 0x53f   : > { %3858 = dma.done.wait (!%p3317_p0), %s2594_s27, 128  }
 0x540   : > { %3860 = vsyncadd (!%p3317_p0), %s2594_s27, 4294967168  ;;  %s5125_s9 = sld [smem:[#allocation35_spill]]  ;;  %s5126_s19 = sld [smem:[#allocation30_spill]] }
 0x541   : > { %s5127_s13 = sld [smem:[#allocation36_spill]]  ;;  %s5128_s20 = smov %s3871_s21 }
 0x546   : > { %p38_p5 = scmp.ge.s32.totalorder %s5125_s9, 4  }
 0x547   : > { %s5129_s21 = smov %s5127_s13 }
 0x548   :  { %40 = sbr.rel (!%p38_p5) target bundleno = 20 (0x14), region = 182 }
 0x54f   :  { %2599 = vsyncpa [#allocation4], 1 }
 0x550   :  { %2601 = vsyncpa [#allocation4 + $0x1], 1 }
 0x551   :  { %2602 = vsyncpa [#allocation7], 1 }
 0x552   :  { %2604 = vsyncpa [#allocation7 + $0x1], 1 }
 0x553   :  { %2605 = vsyncpa [#allocation10], 1 }
 0x554   :  { %2607 = vsyncpa [#allocation10 + $0x1], 1 }
 0x555   :  { %2608 = vsyncpa [#allocation13], 1 }
 0x556   :  { %2609 = vsyncpa [#allocation16], 1 }
 0x557   :  { %2610 = vsyncpa [#allocation5], 1 }
 0x558   :  { %2612 = vsyncpa [#allocation5 + $0x1], 1 }
 0x559   :  { %2613 = vsyncpa [#allocation20], 1 }
 0x55a   :  { %2615 = vsyncpa [#allocation20 + $0x1], 1 }

</bundles_post_ra>
